<compile_context>
chip_gen: v7x
topology: tpu7x:2x2x1
jax: 0.10.0
libtpu: 0.0.40
codegen_flags: <defaults>
</compile_context>

<pallas_src>
import jax
import jax.numpy as jnp
import numpy as np
from jax import lax
from jax.experimental import pallas as pl
from jax.experimental.pallas import tpu as pltpu


# ----------------------------------------------------------------------------
# Tile selection helpers
# ----------------------------------------------------------------------------
def _largest_aligned_divisor(n, align, cap):
    best = None
    cap = min(cap, n)
    for d in range(align, cap + 1, align):
        if n % d == 0:
            best = d
    return best


def _pick_tiles(B, S, E, h_itemsize):
    """tb multiple of 8 (or ==B), ts multiple of 128 (or ==S), h tile ~8 MiB."""
    target_h_bytes = 8 << 20
    tb = None
    if B >= 16:
        # keep >=2 batch blocks so the "parallel" axis shards across v7x's 2 TCs
        tb = _largest_aligned_divisor(B, 8, min(B // 2, 128))
    if tb is None:
        tb = _largest_aligned_divisor(B, 8, min(B, 128))
    if tb is None:
        tb = B
    cap = max(128, target_h_bytes // max(1, tb * E * h_itemsize))
    ts = _largest_aligned_divisor(S, 128, cap)
    if ts is None:
        ts = S
    return tb, ts


# ----------------------------------------------------------------------------
# Kernel A bodies: masked mean pooling (VPU masked sum, f32 accumulators)
# ----------------------------------------------------------------------------
def _accumulate(h_ref, mask_ref, acc_ref, den_ref):
    @pl.when(pl.program_id(1) == 0)
    def _init():
        acc_ref[...] = jnp.zeros_like(acc_ref)
        den_ref[...] = jnp.zeros_like(den_ref)

    h = h_ref[...].astype(jnp.float32)                 # [tb, ts, E] (upcast: safe on v5e too)
    m = mask_ref[...]                                  # [tb, ts] f32, lane-dense
    acc_ref[...] += jnp.sum(h * m[:, :, None], axis=1)         # VPU mul + XLU sublane reduce
    den_ref[...] += jnp.sum(m, axis=1, keepdims=True)          # XLU lane reduce -> [tb, 1]


def _pooled_value(acc_ref, den_ref):
    # guard: all-zero mask rows give 0 instead of NaN (semantic delta vs PyTorch)
    inv = pl.reciprocal(jnp.maximum(den_ref[...], 1.0), approx=False)
    return acc_ref[...] * inv


def _pool_classifier_kernel(h_ref, mask_ref, w1_ref, b1_ref, w2_ref, b2_ref,
                            out_ref, acc_ref, den_ref):
    """Pooling with the classifier fused into the last sequence step."""
    _accumulate(h_ref, mask_ref, acc_ref, den_ref)

    @pl.when(pl.program_id(1) == pl.num_programs(1) - 1)
    def _finalize():
        pooled = _pooled_value(acc_ref, den_ref)                       # [tb, E] f32
        hid = jnp.tanh(jnp.dot(pooled, w1_ref[...],
                               preferred_element_type=jnp.float32) + b1_ref[...])
        out_ref[...] = (jnp.dot(hid, w2_ref[...],
                                preferred_element_type=jnp.float32)
                        + b2_ref[...]).astype(out_ref.dtype)


def _pool_kernel(h_ref, mask_ref, pooled_ref, acc_ref, den_ref):
    """Pooling only (mixup path needs the full pooled batch before blending)."""
    _accumulate(h_ref, mask_ref, acc_ref, den_ref)

    @pl.when(pl.program_id(1) == pl.num_programs(1) - 1)
    def _finalize():
        pooled_ref[...] = _pooled_value(acc_ref, den_ref).astype(pooled_ref.dtype)


def _pool_grid_spec(B, S, EP, H, CP, tb, ts, *, fused):
    common_in = [
        pl.BlockSpec((tb, ts, EP), lambda i, j: (i, j, 0)),   # h (caller dtype)
        pl.BlockSpec((tb, ts), lambda i, j: (i, j)),          # mask f32, lane-dense
    ]
    if fused:
        in_specs = common_in + [
            pl.BlockSpec((EP, H), lambda i, j: (0, 0)),       # w1 (VMEM-resident)
            pl.BlockSpec((1, H), lambda i, j: (0, 0)),        # b1
            pl.BlockSpec((H, CP), lambda i, j: (0, 0)),       # w2 (padded)
            pl.BlockSpec((1, CP), lambda i, j: (0, 0)),       # b2 (padded)
        ]
        out_specs = pl.BlockSpec((tb, CP), lambda i, j: (i, 0))
    else:
        in_specs = common_in
        out_specs = pl.BlockSpec((tb, EP), lambda i, j: (i, 0))
    return pltpu.PrefetchScalarGridSpec(
        num_scalar_prefetch=0,
        grid=(B // tb, S // ts),
        in_specs=in_specs,
        out_specs=out_specs,
        scratch_shapes=[
            pltpu.VMEM((tb, EP), jnp.float32),   # masked-sum accumulator
            pltpu.VMEM((tb, 1), jnp.float32),    # denominator accumulator
        ],
    )


# ----------------------------------------------------------------------------
# Kernel B: mixup blend + Linear -> Tanh -> Linear classifier (mixup path only)
# ----------------------------------------------------------------------------
def _mixup_classifier_kernel(lam_ref, idx_ref, pooled_ref,
                             w1_ref, b1_ref, w2_ref, b2_ref, out_ref):
    pooled = pooled_ref[...]                                   # [B, EP] f32
    B = pooled.shape[0]
    lam = lam_ref[0]

    # one-hot permutation: onehot_t[j, i] = (j == idx[i]); permuted = onehot_t^T @ pooled
    idx_row = idx_ref[...]                                     # [1, B] int32 (lane-dense)
    j_iota = lax.broadcasted_iota(jnp.int32, (B, B), 0)
    onehot_t = (j_iota == idx_row).astype(jnp.float32)
    permuted = lax.dot_general(onehot_t, pooled,
                               dimension_numbers=(((0,), (0,)), ((), ())),
                               preferred_element_type=jnp.float32)   # [B, EP]
    mixed = lam * pooled + (1.0 - lam) * permuted

    hid = jnp.tanh(jnp.dot(mixed, w1_ref[...],
                           preferred_element_type=jnp.float32) + b1_ref[...])
    out_ref[...] = (jnp.dot(hid, w2_ref[...],
                            preferred_element_type=jnp.float32)
                    + b2_ref[...]).astype(out_ref.dtype)


# ----------------------------------------------------------------------------
# Wrapper
# ----------------------------------------------------------------------------
def mixup_sentence_classifier(h, attention_mask, w1, b1, w2, b2,
                              mixup_indices=None, lambda_=None,
                              *, tb=None, ts=None):
    """h: [B,S,E] embeddings (pass bf16 to halve HBM traffic),
    attention_mask: [B,S] (numeric/bool)."""
    B, S, E = h.shape
    H = w1.shape[1]
    C = w2.shape[1]
    h_itemsize = jnp.dtype(h.dtype).itemsize

    # Pad E up to a lane-dense multiple of 128; zero columns contribute nothing
    # to the masked sum and w1 gets matching zero rows, so results are unchanged.
    EP = pl.cdiv(E, 128) * 128
    if EP != E:
        h = jnp.pad(h, ((0, 0), (0, 0), (0, EP - E)))
    CP = pl.cdiv(C, 128) * 128

    if tb is None or ts is None:
        atb, ats = _pick_tiles(B, S, EP, h_itemsize)
        tb = atb if tb is None else tb
        ts = ats if ts is None else ts
    assert B % tb == 0 and S % ts == 0, "tile sizes must divide (B, S)"
    assert tb == B or tb % 8 == 0, "tb must be a multiple of 8 (or equal B)"
    assert ts == S or ts % 128 == 0, \
        "ts must be a multiple of 128 (or equal S): mask lanes / packed h sublanes"

    mask2 = attention_mask.astype(jnp.float32)                     # [B, S] lane-dense

    w1f = jnp.zeros((EP, H), jnp.float32).at[:E, :].set(w1.astype(jnp.float32))
    b1f = b1.astype(jnp.float32).reshape(1, H)
    w2p = jnp.zeros((H, CP), jnp.float32).at[:, :C].set(w2.astype(jnp.float32))
    b2p = jnp.zeros((1, CP), jnp.float32).at[:, :C].set(
        b2.astype(jnp.float32).reshape(1, C))

    # explicit VMEM budget: double-buffered h + mask, accumulators, resident
    # weights and double-buffered output, with ~1.5x headroom
    est_bytes = (2 * tb * ts * EP * h_itemsize
                 + 2 * tb * ts * 4
                 + tb * EP * 4 + tb * 128 * 4
                 + EP * H * 4 + H * 4 + H * CP * 4 + CP * 4
                 + 2 * tb * max(EP, CP) * 4)
    vmem_limit = int(min(96 << 20, max(32 << 20, est_bytes * 3 // 2)))
    cparams = pltpu.CompilerParams(
        dimension_semantics=("parallel", "arbitrary"),
        vmem_limit_bytes=vmem_limit)

    if mixup_indices is None:
        # Inference path: classifier fused into kernel A's finalize
        # (no pooled [B,E] HBM round trip, single pallas_call).
        logits_p = pl.pallas_call(
            _pool_classifier_kernel,
            out_shape=jax.ShapeDtypeStruct((B, CP), jnp.float32),
            grid_spec=_pool_grid_spec(B, S, EP, H, CP, tb, ts, fused=True),
            compiler_params=cparams,
        )(h, mask2, w1f, b1f, w2p, b2p)
        return logits_p[:, :C]

    # Mixup path: pooling kernel, then blend + classifier (permutation crosses
    # batch tiles, so it cannot be fused into the gridded pooling kernel).
    pooled = pl.pallas_call(
        _pool_kernel,
        out_shape=jax.ShapeDtypeStruct((B, EP), jnp.float32),
        grid_spec=_pool_grid_spec(B, S, EP, H, CP, tb, ts, fused=False),
        compiler_params=cparams,
    )(h, mask2)

    lam = jnp.asarray(lambda_, dtype=jnp.float32).reshape((1,))
    # clip guards against out-of-range indices (semantic delta vs PyTorch error)
    idx_row = jnp.clip(mixup_indices.astype(jnp.int32), 0, B - 1).reshape(1, B)

    smem = pl.BlockSpec(memory_space=pltpu.MemorySpace.SMEM)
    vmem = pl.BlockSpec(memory_space=pltpu.MemorySpace.VMEM)
    logits_p = pl.pallas_call(
        _mixup_classifier_kernel,
        out_shape=jax.ShapeDtypeStruct((B, CP), jnp.float32),
        in_specs=[smem, vmem, vmem, vmem, vmem, vmem, vmem],
        out_specs=vmem,
    )(lam, idx_row, pooled, w1f, b1f, w2p, b2p)
    return logits_p[:, :C]


# ----------------------------------------------------------------------------
# Params / reference / test harness
# ----------------------------------------------------------------------------
def _init_params(key, vocab, embed_dim, hidden, n_class):
    k_emb, k_w1, k_b1, k_w2, k_b2 = jax.random.split(key, 5)
    embed_table = jax.random.normal(k_emb, (vocab, embed_dim), jnp.float32) * 0.1
    lim1 = 1.0 / np.sqrt(embed_dim)
    w1 = jax.random.uniform(k_w1, (embed_dim, hidden), jnp.float32, -lim1, lim1)
    b1 = jax.random.uniform(k_b1, (1, hidden), jnp.float32, -lim1, lim1)
    lim2 = 1.0 / np.sqrt(hidden)
    w2 = jax.random.uniform(k_w2, (hidden, n_class), jnp.float32, -lim2, lim2)
    b2 = jax.random.uniform(k_b2, (1, n_class), jnp.float32, -lim2, lim2)
    return embed_table, w1, b1, w2, b2


def _reference(h, mask, w1, b1, w2, b2, mixup_indices, lambda_):
    m = mask.astype(jnp.float32)
    pooled = jnp.sum(h * m[:, :, None], axis=1) / jnp.sum(m, axis=1, keepdims=True)
    if mixup_indices is not None:
        pooled = lambda_ * pooled + (1.0 - lambda_) * pooled[mixup_indices]
    hid = jnp.tanh(pooled @ w1 + b1)
    return hid @ w2 + b2


if __name__ == "__main__":
    # small shapes that still satisfy TPU layout constraints and exercise both
    # grid axes: grid = (B//TB, S//TS) = (2, 2)
    B, S, E, VOCAB, HIDDEN, N_CLASS = 16, 256, 128, 50, 128, 4
    TB, TS = 8, 128

    key = jax.random.PRNGKey(0)
    k_params, k_ids, k_len, k_perm, k_lam = jax.random.split(key, 5)
    embed_table, w1, b1, w2, b2 = _init_params(k_params, VOCAB, E, HIDDEN, N_CLASS)

    input_ids = jax.random.randint(k_ids, (B, S), 0, VOCAB, dtype=jnp.int32)
    lengths = jax.random.randint(k_len, (B,), 1, S + 1, dtype=jnp.int32)
    attention_mask = (jnp.arange(S)[None, :] < lengths[:, None]).astype(jnp.int32)
    mixup_indices = jax.random.permutation(k_perm, B).astype(jnp.int32)
    lambda_ = float(jax.random.uniform(k_lam, ()))

    # TODO(synk): real transformer embedding_model is external; stand-in lookup,
    # producing bf16 activations as a bf16 transformer stack would.
    h = jnp.take(embed_table, input_ids, axis=0).astype(jnp.bfloat16)   # [B, S, E]

    out_mix = jax.block_until_ready(
        mixup_sentence_classifier(h, attention_mask, w1, b1, w2, b2,
                                  mixup_indices=mixup_indices, lambda_=lambda_,
                                  tb=TB, ts=TS))
    out_inf = jax.block_until_ready(
        mixup_sentence_classifier(h, attention_mask, w1, b1, w2, b2,
                                  tb=TB, ts=TS))

    # reference consumes the same bf16-quantized activations the kernel sees
    h_f32 = h.astype(jnp.float32)
    ref_mix = _reference(h_f32, attention_mask, w1, b1, w2, b2, mixup_indices, lambda_)
    ref_inf = _reference(h_f32, attention_mask, w1, b1, w2, b2, None, None)

    np.testing.assert_allclose(np.asarray(out_mix), np.asarray(ref_mix),
                               rtol=5e-3, atol=1e-3)
    np.testing.assert_allclose(np.asarray(out_inf), np.asarray(ref_inf),
                               rtol=5e-3, atol=1e-3)
    print("KERNEL_OK")
</pallas_src>

<mosaic_0001>
module attributes {stable_mosaic.version = 11 : i64} {
  func.func @_pool_kernel(%arg0: i32, %arg1: i32, %arg2: memref<8x128x128xbf16, #tpu.memory_space<vmem>>, %arg3: memref<8x128xf32, #tpu.memory_space<vmem>>, %arg4: memref<8x128xf32, #tpu.memory_space<vmem>>, %arg5: memref<8x128xf32, #tpu.memory_space<vmem>>, %arg6: memref<8x1xf32, #tpu.memory_space<vmem>>) attributes {dimension_semantics = [#tpu.dimension_semantics<parallel>, #tpu.dimension_semantics<arbitrary>], iteration_bounds = array<i64: 2, 2>, scalar_prefetch = 0 : i64, scratch_operands = 2 : i64, tpu.core_type = #tpu.core_type<tc>, window_params = [{transform_indices = @transform_0, window_bounds = array<i64: 8, 128, 128>}, {transform_indices = @transform_1, window_bounds = array<i64: 8, 128>}, {transform_indices = @transform_2, window_bounds = array<i64: 8, 128>}]} {
    %c0_i32 = arith.constant 0 : i32
    %0 = arith.cmpi eq, %arg1, %c0_i32 : i32
    %1 = arith.extui %0 : i1 to i32
    %c0_i32_0 = arith.constant 0 : i32
    %2 = arith.cmpi ne, %1, %c0_i32_0 : i32
    scf.if %2 {
      %cst_15 = arith.constant 0.000000e+00 : f32
      %21 = vector.broadcast %cst_15 : f32 to vector<8x128xf32>
      %c0_16 = arith.constant 0 : index
      %c0_17 = arith.constant 0 : index
      %22 = vector.load %arg5[%c0_16, %c0_17] : memref<8x128xf32, #tpu.memory_space<vmem>>, vector<8x128xf32>
      tpu.vector_store %arg5[%c0_16, %c0_17], %21 {strides = array<i32>} : memref<8x128xf32, #tpu.memory_space<vmem>>, vector<8x128xf32>,
      %cst_18 = arith.constant 0.000000e+00 : f32
      %23 = vector.broadcast %cst_18 : f32 to vector<8x1xf32>
      %c0_19 = arith.constant 0 : index
      %c0_20 = arith.constant 0 : index
      %24 = vector.load %arg6[%c0_19, %c0_20] : memref<8x1xf32, #tpu.memory_space<vmem>>, vector<8x1xf32>
      tpu.vector_store %arg6[%c0_19, %c0_20], %23 {strides = array<i32>} : memref<8x1xf32, #tpu.memory_space<vmem>>, vector<8x1xf32>,
    } else {
    }
    %c0 = arith.constant 0 : index
    %c0_1 = arith.constant 0 : index
    %c0_2 = arith.constant 0 : index
    %3 = vector.load %arg2[%c0, %c0_1, %c0_2] : memref<8x128x128xbf16, #tpu.memory_space<vmem>>, vector<8x128x128xbf16>
    %4 = arith.extf %3 : vector<8x128x128xbf16> to vector<8x128x128xf32>
    %c0_3 = arith.constant 0 : index
    %c0_4 = arith.constant 0 : index
    %5 = vector.load %arg3[%c0_3, %c0_4] : memref<8x128xf32, #tpu.memory_space<vmem>>, vector<8x128xf32>
    %c0_5 = arith.constant 0 : index
    %c0_6 = arith.constant 0 : index
    %6 = vector.load %arg5[%c0_5, %c0_6] : memref<8x128xf32, #tpu.memory_space<vmem>>, vector<8x128xf32>
    %7 = vector.shape_cast %5 : vector<8x128xf32> to vector<8x128x1xf32>
    %8 = vector.broadcast %7 : vector<8x128x1xf32> to vector<8x128x128xf32>
    %9 = arith.mulf %4, %8 : vector<8x128x128xf32>
    %cst = arith.constant dense<0.000000e+00> : vector<8x128xf32>
    %10 = vector.multi_reduction <add>, %9, %cst [1] : vector<8x128x128xf32> to vector<8x128xf32>
    %11 = arith.addf %6, %10 : vector<8x128xf32>
    %c0_7 = arith.constant 0 : index
    %c0_8 = arith.constant 0 : index
    %12 = vector.load %arg5[%c0_7, %c0_8] : memref<8x128xf32, #tpu.memory_space<vmem>>, vector<8x128xf32>
    tpu.vector_store %arg5[%c0_7, %c0_8], %11 {strides = array<i32>} : memref<8x128xf32, #tpu.memory_space<vmem>>, vector<8x128xf32>,
    %c0_9 = arith.constant 0 : index
    %c0_10 = arith.constant 0 : index
    %13 = vector.load %arg6[%c0_9, %c0_10] : memref<8x1xf32, #tpu.memory_space<vmem>>, vector<8x1xf32>
    %cst_11 = arith.constant dense<0.000000e+00> : vector<8xf32>
    %14 = vector.multi_reduction <add>, %5, %cst_11 [1] : vector<8x128xf32> to vector<8xf32>
    %15 = vector.shape_cast %14 : vector<8xf32> to vector<8x1xf32>
    %16 = arith.addf %13, %15 : vector<8x1xf32>
    %c0_12 = arith.constant 0 : index
    %c0_13 = arith.constant 0 : index
    %17 = vector.load %arg6[%c0_12, %c0_13] : memref<8x1xf32, #tpu.memory_space<vmem>>, vector<8x1xf32>
    tpu.vector_store %arg6[%c0_12, %c0_13], %16 {strides = array<i32>} : memref<8x1xf32, #tpu.memory_space<vmem>>, vector<8x1xf32>,
    %c1_i32 = arith.constant 1 : i32
    %18 = arith.cmpi eq, %arg1, %c1_i32 : i32
    %19 = arith.extui %18 : i1 to i32
    %c0_i32_14 = arith.constant 0 : i32
    %20 = arith.cmpi ne, %19, %c0_i32_14 : i32
    scf.if %20 {
      %c0_15 = arith.constant 0 : index
      %c0_16 = arith.constant 0 : index
      %21 = vector.load %arg6[%c0_15, %c0_16] : memref<8x1xf32, #tpu.memory_space<vmem>>, vector<8x1xf32>
      %cst_17 = arith.constant 1.000000e+00 : f32
      %22 = vector.broadcast %cst_17 : f32 to vector<8x1xf32>
      %23 = arith.maximumf %21, %22 : vector<8x1xf32>
      %24 = tpu.reciprocal %23 : vector<8x1xf32> -> vector<8x1xf32>
      %c0_18 = arith.constant 0 : index
      %c0_19 = arith.constant 0 : index
      %25 = vector.load %arg5[%c0_18, %c0_19] : memref<8x128xf32, #tpu.memory_space<vmem>>, vector<8x128xf32>
      %26 = vector.broadcast %24 : vector<8x1xf32> to vector<8x128xf32>
      %27 = arith.mulf %25, %26 : vector<8x128xf32>
      %c0_20 = arith.constant 0 : index
      %c0_21 = arith.constant 0 : index
      %28 = vector.load %arg4[%c0_20, %c0_21] : memref<8x128xf32, #tpu.memory_space<vmem>>, vector<8x128xf32>
      tpu.vector_store %arg4[%c0_20, %c0_21], %27 {strides = array<i32>} : memref<8x128xf32, #tpu.memory_space<vmem>>, vector<8x128xf32>,
    } else {
    }
    return
  }
  func.func @transform_0(%arg0: i32, %arg1: i32) -> (i32, i32, i32) {
    %c0_i32 = arith.constant 0 : i32
    %c0_i32_0 = arith.constant 0 : i32
    return %arg0, %arg1, %c0_i32 : i32, i32, i32
  }
  func.func @transform_1(%arg0: i32, %arg1: i32) -> (i32, i32) {
    %c0_i32 = arith.constant 0 : i32
    return %arg0, %arg1 : i32, i32
  }
  func.func @transform_2(%arg0: i32, %arg1: i32) -> (i32, i32) {
    %c0_i32 = arith.constant 0 : i32
    %c0_i32_0 = arith.constant 0 : i32
    return %arg0, %c0_i32 : i32, i32
  }
}

</mosaic_0001>

<bundles_post_ra>
// kernel: tpu_custom_call.1
= control target key start
LH: loop header
LB: loop body
LE: loop exit
PB: predicated region body
PF: predicated region fallthrough
CT: control target
= control target key end

     0   :  { %s2747_s0 = inlined_call_operand.hbm [shape: bf16[16,256,128], index: 0, kind: input, shape index: {}]   ;;  %s2748_s1 = inlined_call_operand.hbm [shape: f32[16,256], index: 1, kind: input, shape index: {}]   ;;  %s2749_s2 = inlined_call_operand.hbm [shape: f32[16,128], index: 2, kind: output, shape index: {}]  }
   0x1   :  { %2755 = sst [smem:[#allocation23_spill]] %s2747_s0 }
   0x2   :  { %7 = vsyncpa [#allocation5], 0 }
   0x3   :  { %9 = vsyncpa [#allocation5 + $0x1], 0 }
   0x4   :  { %10 = vsyncpa [#allocation8], 0 }
   0x5   :  { %12 = vsyncpa [#allocation8 + $0x1], 0 }
   0x6   :  { %13 = vsyncpa [#allocation6], 0 }
   0x7   :  { %15 = vsyncpa [#allocation6 + $0x1], 0  ;;  %s2156_s9 = smov 0   ;;  %s2158_s10 = smov 0  }
   0x8   :  { %s2160_s11 = smov 0   ;;  %s2162_s12 = smov 0  }
   0x9   :  { %s2164_s13 = smov 0   ;;  %s2166_s14 = smov 0  }
   0xa   :  { %s2168_s15 = smov 0   ;;  %s2170_s16 = smov 0  }
   0xb   :  { %s2172_s17 = smov 0   ;;  %s2174_s18 = smov 0  }
   0xc   :  { %s2176_s19 = smov 0  }
   0xd LB: > { %2756 = sst [smem:[#allocation16_spill]] %s2097_s11  ;;  %s1513_s20 = sadd.s32 4294967295, %s2129_s19   ;;  %s2129_s19 = sphi %s2176_s19, %s21_s19   ;;  %s2125_s18 = sphi %s2174_s18, %s2784_s18   ;;  %s2121_s17 = sphi %s2172_s17, %s2783_s17   ;;  %s2117_s16 = sphi %s2170_s16, %s2782_s16   ;;  %s2113_s15 = sphi %s2168_s15, %s2781_s15   ;;  %s2109_s14 = sphi %s2166_s14, %s2774_s14   ;;  %s2105_s13 = sphi %s2164_s13, %s2780_s13   ;;  %s2101_s12 = sphi %s2162_s12, %s2779_s12   ;;  %s2097_s11 = sphi %s2160_s11, %s2772_s11   ;;  %s2093_s10 = sphi %s2158_s10, %s2778_s10   ;;  %s2089_s9 = sphi %s2156_s9, %s2777_s9  }
   0xe   : > { %2757 = sst [smem:[#allocation17_spill]] %s2109_s14  ;;  %s1514_s21 = sadd.s32 4294967294, %s2129_s19  }
   0xf   : > { %s30_s22 = sadd.s32 1, %s2121_s17  ;;  %s33_s23 = sadd.s32 1, %s2125_s18 }
  0x10   : > { %p31_p0 = scmp.ge.s32.totalorder %s30_s22, 2  ;;  %s42_s24 = sadd.s32 1, %s2109_s14 }
  0x11   : > { %p49_p1 = scmp.ne.s32.totalorder %s2109_s14, %s2105_s13  ;;  %p50_p2 = scmp.eq.s32.totalorder %s2129_s19, 0 }
  0x12   : > { %s2786_s22 = smov (%p31_p0, %s30_s22), 0  ;;  %s2788_s23 = smov (!%p31_p0, %s33_s23), %s2125_s18 }
  0x13   : > { %2758 = sst [smem:[#allocation18_spill]] %s2786_s22  ;;  %s38_s25 = ssub.s32 %s2121_s17, %s2786_s22 }
  0x14   : > { %p2222_p3 = por %p50_p2, %p49_p1  ;;  %p35_p4 = scmp.ge.s32.totalorder %s2788_s23, 2 }
  0x15   : > { %p55_p5 = scmp.ne.s32.totalorder %s2105_s13, %s2101_s12  ;;  %p56_p6 = scmp.eq.s32.totalorder %s1513_s20, 0 }
  0x16   : > { %s96_s27 = sadd.s32 1, %s2097_s11  ;;  %s2790_s23 = smov (%p35_p4, %s2788_s23), 0 }
  0x17   : > { %2760 = sst [smem:[#allocation19_spill]] %s2790_s23  ;;  %p2230_p7 = por %p56_p6, %p55_p5 }
  0x18   : > { %p106_p8 = scmp.ne.s32.totalorder %s2097_s11, %s2093_s10  ;;  %s37_s29 = ssub.s32 %s2125_s18, %s2790_s23 }
  0x19   : > { %p107_p9 = scmp.eq.s32.totalorder %s1513_s20, 3  ;;  %s39_s30 = sor.u32 %s38_s25, %s37_s29 }
  0x1a   : > { %p94_p10 = scmp.eq.s32.totalorder %s37_s29, 0  ;;  %p40_p11 = scmp.eq.s32.totalorder %s39_s30, 0 }
  0x1b   : > { %p2238_p12 = por %p107_p9, %p106_p8  ;;  %p112_p13 = scmp.ne.s32.totalorder %s2093_s10, %s2089_s9 }
  0x1c   : > { %s2243_s4 = scalar_select %p94_p10, %s2097_s11, %s96_s27  }
  0x1d   : > { %s2762_s3 = scalar_select %p2238_p12, 1, 0 }
  0x1e   : > { %2763 = sst [smem:[#allocation20_spill]] %s2243_s4  ;;  %p113_p0 = scmp.eq.s32.totalorder %s1514_s21, 3 }
  0x1f   : > { %s2246_s5 = scalar_select %p40_p11, %s2109_s14, %s42_s24  }
  0x20   : > { %p2250_p1 = por %p113_p0, %p112_p13  ;;  %p1516_p2 = scmp.ge.s32.totalorder %s2129_s19, 4 }
  0x21   : > { %2764 = sst [smem:[#allocation21_spill]] %s2246_s5 }
  0x22   : > { %s2765_s6 = scalar_select %p2250_p1, 1, 0 }
  0x23   : > { %129 = sbr.rel (%p1516_p2) target bundleno = 83 (0x53), region = 16 }
  0x2a   : > { %s2256_s7 = sand.u32 1, %s2109_s14   ;;  %s1519_s8 = sshll.u32 %s2121_s17, 4 }
  0x2b   : > { %s1517_s12 = sshll.u32 %s2256_s7, 9  ;;  %s1537_s20 = sshll.u32 %s2125_s18, 8 }
  0x2c   : > { %s144_s21 = sadd.s32 %s1537_s20, %s1519_s8  ;;  %s137_s24 = scalar_lea.vmem [#allocation4], %s1517_s12 }
  0x2d   : > { %s159_s25 = sshll.u32 %s137_s24, 4  ;;  %s1521_s27 = sshll.u32 %s144_s21, 6  ;;  %s160_s25 = int_to_ptr.vmem [resolvable:$true] %s159_s25 }
  0x2e   : > { %s1857_s29 = scalar_select %p2222_p3, [#allocation0], [#allocation12] }
  0x2f   : > { %s2131_s30 = smov 2048   ;;  %s2132_s22 = smov 1024  }
  0x30   : > { %1858 = sst [smem:[#allocation11]] (%p2222_p3), %s2131_s30  ;;  %s2133_s5 = smov 16  }
  0x31   : > { %s151_s23 = sld [smem:[%s1857_s29]]   ;;  %s2134_s8 = smov 64  }
  0x32   : > { %1859 = sst [smem:[#allocation11 + $0x1]] (%p2222_p3), %s2132_s22  ;;  %s2766_s0 = sld [smem:[#allocation23_spill]] }
  0x33   : > { %1860 = sst [smem:[#allocation11 + $0x2]] (%p2222_p3), %s2133_s5  ;;  %s2135_s24 = smov 4  }
  0x34   : > { %1861 = sst [smem:[#allocation11 + $0x3]] (%p2222_p3), %s2134_s8  ;;  %s134_s14 = scalar_lea.sflag [#allocation5], %s2256_s7 }
  0x35   : > { %1862 = sst [smem:[#allocation11 + $0x4]] (%p2222_p3), %s2134_s8  ;;  %s2136_s22 = smov [#allocation10]  }
  0x36   : > { %1863 = sst [smem:[#allocation11 + $0x5]] (%p2222_p3), %s2135_s24  ;;  %s1524_s5 = sshll.u32 %s2256_s7, 3 }
  0x37   : > { %s1522_s29 = sshll.u32 %s151_s23, 26  ;;  %s1525_s4 = sshll.u32 %s2125_s18, 1 }
  0x38   : > { %s146_s21 = scalar_lea.hbm %s2766_s0, %s1521_s27  ;;  %s1523_s30 = sadd.s32 134217728, %s1522_s29 }
  0x39   : > { %1864 = dma.general (%p2222_p3), %s146_s21, 8192, %s160_s25, %s134_s14, %s2136_s22, [#allocation11], %s1523_s30, 0  }
  0x3a   : > { %s191_s12 = sadd.s32 %s2121_s17, %s1525_s4  ;;  %s186_s27 = scalar_lea.vmem [#allocation7], %s1524_s5 }
  0x3b   : > { %s195_s20 = sshll.u32 %s186_s27, 4  ;;  %s1526_s8 = sshll.u32 %s191_s12, 7  ;;  %s2284_s20 = int_to_ptr.vmem [resolvable:$true] %s195_s20 }
  0x3c   : > { %s193_s29 = scalar_lea.hbm %s2748_s1, %s1526_s8  ;;  %s183_s0 = scalar_lea.sflag [#allocation8], %s2256_s7 }
  0x3d   : > { %s1975_s11 = scalar_lea.hbm %s193_s29, 128  ;;  %s1979_s21 = scalar_lea.hbm %s2748_s1, 512 }
  0x3e   : > { %p1976_p4 = scmp.ne.s32.totalorder %s193_s29, %s1975_s11  ;;  %p1980_p8 = scmp.lt.u32.totalorder %s193_s29, %s2748_s1 }
  0x3f   : > { %p1981_p9 = scmp.lt.u32.totalorder %s1979_s21, %s1975_s11  ;;  %p1983_p11 = scmp.lt.u32.totalorder %s1975_s11, %s193_s29 }
  0x40   : > { %p1977_p5 = pnand %p1976_p4, %p2222_p3 }
  0x41   : > { %p1982_p10 = por %p1981_p9, %p1980_p8 }
  0x42   : > { %p1978_p6 = pneg %p1977_p5 }
  0x43   : > { %p1984_p13 = por %p1983_p11, %p1982_p10 }
  0x45   : > { %p1985_p0 = pnand %p1984_p13, %p1978_p6 }
  0x47   : > { %1988 = shalt.err (!%p1985_p0)
}
  0x48   : > { %s1989_s7 = scalar_lea.vmem %s2284_s20, 128  ;;  %s2137_s22 = smov [#allocation7]  }
  0x49   : > { %p1990_p2 = scmp.ne.s32.totalorder %s2284_s20, %s1989_s7  ;;  %s1993_s5 = sshll.u32 %s2137_s22, 4  ;;  %s1994_s5 = int_to_ptr.vmem [resolvable:$false] %s1993_s5 }
  0x4a   : > { %s1995_s12 = scalar_lea.vmem %s1994_s5, 256  ;;  %p1996_p1 = scmp.lt.s32.totalorder %s2284_s20, %s1994_s5 }
  0x4b   : > { %p1991_p4 = pnand %p1990_p2, %p2222_p3  ;;  %p1997_p12 = scmp.lt.s32.totalorder %s1995_s12, %s1989_s7 }
  0x4d   : > { %p1992_p5 = pneg %p1991_p4  ;;  %p1998_p8 = por %p1997_p12, %p1996_p1 }
  0x4f   : > { %p1999_p9 = pnand %p1998_p8, %p1992_p5 }
  0x51   : > { %2002 = shalt.err (!%p1999_p9)
}
  0x52   : > { %1865 = dma.hbm_to_vmem [thread:$0]  (%p2222_p3), %s193_s29, 128, %s2284_s20, %s183_s0  }
  0x53 PF: > { %p1527_p6 = scmp.ge.s32.totalorder %s2129_s19, 1  ;;  %p200_p10 = scmp.lt.s32.totalorder %s2129_s19, 5 }
  0x55   : > { %p201_p11 = pnand %p1527_p6, %p200_p10 }
  0x57   : > { %204 = sbr.rel (%p201_p11) target bundleno = 722 (0x2d2), region = 28 }
  0x5e   : > { %s206_s11 = sand.u32 1, %s2105_s13  }
  0x5f   : > { %s1528_s27 = sshll.u32 %s206_s11, 9  ;;  %s207_s8 = scalar_lea.sflag [#allocation5], %s206_s11 }
  0x60   : > { %s2309_s24 = scalar_lea.vmem [#allocation4], %s1528_s27 }
  0x61   : > { %2076 = dma.done.wait (%p2230_p7), %s207_s8, 8192  }
  0x62   : > { %2078 = vsyncadd (%p2230_p7), %s207_s8, 4294959104  ;;  %s1529_s0 = sshll.u32 %s206_s11, 3  ;;  %s216_s26 = scalar_lea.sflag [#allocation8], %s206_s11 }
  0x63   : > { %s2315_s20 = scalar_lea.vmem [#allocation7], %s1529_s0 }
  0x64   : > { %2080 = dma.done.wait (%p2230_p7), %s216_s26, 128  }
  0x65   : > { %2082 = vsyncadd (%p2230_p7), %s216_s26, 4294967168  ;;  %s242_s23 = sand.u32 1, %s2093_s10   ;;  %p1531_p3 = scmp.ne.s32.totalorder %s2113_s15, 0 }
  0x66   : > { %s2324_s29 = sshll.u32 %s242_s23, 3  ;;  %vm252_vm0 = vcmask (!%p1531_p3), 7168   ;;  %v2138_v0 = vmov (!%p1531_p3), 0.0  }
  0x67   : > { %s244_s14 = scalar_lea.vmem [#allocation9], %s2324_s29  ;;  %250 = sbr.rel (%p1531_p3) target bundleno = 110 (0x6e), region = 40  ;;  %251 = vst [vmem:[#allocation2] sm:$0xff] (!%p1531_p3), %v2138_v0  ;;  %253 = vst.msk [vmem:[#allocation3] sm:$0xff] (!%p1531_p3), %vm252_vm0, %v2138_v0 }
  0x6e PF: > { %v512_v1 = vlaneseq  ;;  %v2331_v3 = vld [vmem:[%s2315_s20] sm:$0xff]  ;;  %v1795_v44 = vld [vmem:[%s2309_s24 + $0x10] sm:$0xff]   ;;  %vm1352_vm1 = vcmask 1041409   ;;  %vm1354_vm2 = vcmask 1042434   ;;  %vm1356_vm3 = vcmask 1043459   ;;  %p1532_p7 = scmp.ne.s32.totalorder %s2113_s15, 1 }
  0x6f   : > { %v1539_v24 = vld [vmem:[%s2309_s24] sm:$0xff]   ;;  %v1794_v28 = vld [vmem:[%s2309_s24 + $0x8] sm:$0xff]   ;;  %v1803_v53 = vld [vmem:[%s2309_s24 + $0x50] sm:$0xff]   ;;  %v1548_v54 = vunpack.c.l.bf16 %v1795_v44  ;;  %v1549_v55 = vunpack.c.h.bf16 %v1795_v44  ;;  %vm1358_vm4 = vcmask 1044484   ;;  %vm1360_vm5 = vcmask 1045509  }
  0x70   : > { %v2328_v2 = vshrl.u32 %v512_v1, 7  ;;  %v1541_v25 = vunpack.c.h.bf16 %v1539_v24  ;;  %v1540_v29 = vunpack.c.l.bf16 %v1539_v24  ;;  %v1544_v30 = vunpack.c.l.bf16 %v1794_v28  ;;  %v1801_v35 = vld [vmem:[%s2309_s24 + $0x40] sm:$0xff]   ;;  %v1802_v43 = vld [vmem:[%s2309_s24 + $0x48] sm:$0xff]   ;;  %v1804_v1 = vld [vmem:[%s2309_s24 + $0x58] sm:$0xff]  }
  0x71   : > { %v1545_v37 = vunpack.c.h.bf16 %v1794_v28  ;;  %v1573_v41 = vunpack.c.h.bf16 %v1801_v35  ;;  %v1572_v42 = vunpack.c.l.bf16 %v1801_v35  ;;  %v1577_v51 = vunpack.c.h.bf16 %v1802_v43  ;;  %v1805_v24 = vld [vmem:[%s2309_s24 + $0x60] sm:$0xff]  }
  0x72   : > { %v514_v4 = vsub.s32 0, %v2328_v2  ;;  %v581_v6 = vsub.s32 1, %v2328_v2  ;;  %v648_v8 = vsub.s32 2, %v2328_v2  ;;  %v715_v10 = vsub.s32 3, %v2328_v2 }
  0x73   : > { %v782_v16 = vsub.s32 4, %v2328_v2  ;;  %v1576_v52 = vunpack.c.l.bf16 %v1802_v43  ;;  %v1580_v59 = vunpack.c.l.bf16 %v1803_v53  ;;  %v1581_v63 = vunpack.c.h.bf16 %v1803_v53 }
  0x74   : > { %v515_v5 = vrot.slane %v2331_v3, %v514_v4  ;;  %v582_v7 = vrot.slane %v2331_v3, %v581_v6  ;;  %v649_v9 = vrot.slane %v2331_v3, %v648_v8  ;;  %v716_v11 = vrot.slane %v2331_v3, %v715_v10 }
  0x75   : > { %v2345_v19 = vrot.slane %v2331_v3, %v782_v16  ;;  %v849_v4 = vsub.s32 5, %v2328_v2  ;;  %v1585_v16 = vunpack.c.h.bf16 %v1804_v1  ;;  %vm1362_vm6 = vcmask 1046534  }
  0x76   : > { %525 = vbcast.lane.b32.xlu1 %v515_v5, 272  ;;  %517 = vbcast.lane.b32.xlu0 %v515_v5, 256  ;;  %vm1364_vm7 = vcmask 1047559   ;;  %vm1373_vm8 = vcmask 7168  }
  0x7a   : > { %529 = vbcast.lane.b32.xlu1 %v515_v5, 280  ;;  %521 = vbcast.lane.b32.xlu0 %v515_v5, 264 }
  0x7e   : > { %537 = vbcast.lane.b32.xlu1 %v515_v5, 296  ;;  %533 = vbcast.lane.b32.xlu0 %v515_v5, 288 }
  0x82   : > { %545 = vbcast.lane.b32.xlu1 %v515_v5, 312  ;;  %541 = vbcast.lane.b32.xlu0 %v515_v5, 304 }
  0x86   : > { %553 = vbcast.lane.b32.xlu1 %v515_v5, 328  ;;  %549 = vbcast.lane.b32.xlu0 %v515_v5, 320 }
  0x8a   : > { %561 = vbcast.lane.b32.xlu1 %v515_v5, 344  ;;  %557 = vbcast.lane.b32.xlu0 %v515_v5, 336 }
  0x8e   : > { %569 = vbcast.lane.b32.xlu1 %v515_v5, 360  ;;  %565 = vbcast.lane.b32.xlu0 %v515_v5, 352 }
  0x92   : > { %577 = vbcast.lane.b32.xlu1 %v515_v5, 376  ;;  %573 = vbcast.lane.b32.xlu0 %v515_v5, 368  ;;  %v1796_v5 = vld [vmem:[%s2309_s24 + $0x18] sm:$0xff]  }
  0x93   : > { %v1553_v28 = vunpack.c.h.bf16 %v1796_v5 }
  0x96   : > { %588 = vbcast.lane.b32.xlu1 %v582_v7, 264  ;;  %584 = vbcast.lane.b32.xlu0 %v582_v7, 256 }
  0x9a   : > { %596 = vbcast.lane.b32.xlu1 %v582_v7, 280  ;;  %592 = vbcast.lane.b32.xlu0 %v582_v7, 272 }
  0x9e   : > { %604 = vbcast.lane.b32.xlu1 %v582_v7, 296  ;;  %600 = vbcast.lane.b32.xlu0 %v582_v7, 288 }
  0xa2   : > { %612 = vbcast.lane.b32.xlu1 %v582_v7, 312  ;;  %608 = vbcast.lane.b32.xlu0 %v582_v7, 304 }
  0xa6   : > { %620 = vbcast.lane.b32.xlu1 %v582_v7, 328  ;;  %616 = vbcast.lane.b32.xlu0 %v582_v7, 320 }
  0xaa   : > { %628 = vbcast.lane.b32.xlu1 %v582_v7, 344  ;;  %624 = vbcast.lane.b32.xlu0 %v582_v7, 336 }
  0xae   : > { %636 = vbcast.lane.b32.xlu1 %v582_v7, 360  ;;  %632 = vbcast.lane.b32.xlu0 %v582_v7, 352 }
  0xb2   : > { %644 = vbcast.lane.b32.xlu1 %v582_v7, 376  ;;  %640 = vbcast.lane.b32.xlu0 %v582_v7, 368 }
  0xb6   : > { %655 = vbcast.lane.b32.xlu1 %v649_v9, 264  ;;  %651 = vbcast.lane.b32.xlu0 %v649_v9, 256 }
  0xba   : > { %663 = vbcast.lane.b32.xlu1 %v649_v9, 280  ;;  %659 = vbcast.lane.b32.xlu0 %v649_v9, 272 }
  0xbe   : > { %671 = vbcast.lane.b32.xlu1 %v649_v9, 296  ;;  %667 = vbcast.lane.b32.xlu0 %v649_v9, 288 }
  0xc2   : > { %679 = vbcast.lane.b32.xlu1 %v649_v9, 312  ;;  %675 = vbcast.lane.b32.xlu0 %v649_v9, 304 }
  0xc6   : > { %687 = vbcast.lane.b32.xlu1 %v649_v9, 328  ;;  %683 = vbcast.lane.b32.xlu0 %v649_v9, 320 }
  0xca   : > { %695 = vbcast.lane.b32.xlu1 %v649_v9, 344  ;;  %691 = vbcast.lane.b32.xlu0 %v649_v9, 336 }
  0xce   : > { %703 = vbcast.lane.b32.xlu1 %v649_v9, 360  ;;  %699 = vbcast.lane.b32.xlu0 %v649_v9, 352 }
  0xd2   : > { %711 = vbcast.lane.b32.xlu1 %v649_v9, 376  ;;  %707 = vbcast.lane.b32.xlu0 %v649_v9, 368 }
  0xd6   : > { %722 = vbcast.lane.b32.xlu1 %v716_v11, 264  ;;  %718 = vbcast.lane.b32.xlu0 %v716_v11, 256 }
  0xda   : > { %730 = vbcast.lane.b32.xlu1 %v716_v11, 280  ;;  %726 = vbcast.lane.b32.xlu0 %v716_v11, 272 }
  0xde   : > { %738 = vbcast.lane.b32.xlu1 %v716_v11, 296  ;;  %734 = vbcast.lane.b32.xlu0 %v716_v11, 288 }
  0xe2   : > { %746 = vbcast.lane.b32.xlu1 %v716_v11, 312  ;;  %742 = vbcast.lane.b32.xlu0 %v716_v11, 304 }
  0xe6   : > { %754 = vbcast.lane.b32.xlu1 %v716_v11, 328  ;;  %750 = vbcast.lane.b32.xlu0 %v716_v11, 320 }
  0xe8   : > { %v526_v12 = vpop.permute.xlu1 %525  ;;  %v518_v13 = vpop.permute.xlu0 %517 }
  0xe9   : > { %v1048_v34 = vmul.f32 %v1540_v29, %v518_v13  ;;  %v1050_v36 = vmul.f32 %v1544_v30, %v526_v12 }
  0xea   : > { %762 = vbcast.lane.b32.xlu1 %v716_v11, 344  ;;  %758 = vbcast.lane.b32.xlu0 %v716_v11, 336 }
  0xec   : > { %v530_v14 = vpop.permute.xlu1 %529  ;;  %v522_v15 = vpop.permute.xlu0 %521 }
  0xed   : > { %v1049_v31 = vmul.f32 %v1541_v25, %v522_v15  ;;  %v1051_v45 = vmul.f32 %v1545_v37, %v530_v14  ;;  %v1584_v14 = vunpack.c.l.bf16 %v1804_v1  ;;  %v1552_v15 = vunpack.c.l.bf16 %v1796_v5  ;;  %v1807_v5 = vld [vmem:[%s2309_s24 + $0x70] sm:$0xff]  }
  0xee   : > { %770 = vbcast.lane.b32.xlu1 %v716_v11, 360  ;;  %766 = vbcast.lane.b32.xlu0 %v716_v11, 352 }
  0xef   : > { %v1176_v38 = vadd.f32 %v1049_v31, %v1048_v34 }
  0xf0   : > { %v2342_v17 = vpop.permute.xlu1 %537  ;;  %v534_v18 = vpop.permute.xlu0 %533 }
  0xf1   : > { %v1177_v46 = vadd.f32 %v1176_v38, %v1050_v36  ;;  %v1052_v0 = vmul.f32 %v1548_v54, %v534_v18  ;;  %v1053_v7 = vmul.f32 %v1549_v55, %v2342_v17  ;;  %v2394_v18 = vrot.slane %v2331_v3, %v849_v4  ;;  %v1797_v38 = vld [vmem:[%s2309_s24 + $0x20] sm:$0xff]  }
  0xf2   : > { %778 = vbcast.lane.b32.xlu1 %v716_v11, 376  ;;  %774 = vbcast.lane.b32.xlu0 %v716_v11, 368  ;;  %v916_v17 = vsub.s32 6, %v2328_v2  ;;  %v1588_v36 = vunpack.c.l.bf16 %v1805_v24 }
  0xf3   : > { %v1178_v56 = vadd.f32 %v1177_v46, %v1051_v45 }
  0xf4   : > { %v2347_v20 = vpop.permute.xlu1 %545  ;;  %v2349_v21 = vpop.permute.xlu0 %541 }
  0xf5   : > { %v1179_v8 = vadd.f32 %v1178_v56, %v1052_v0  ;;  %v1054_v37 = vmul.f32 %v1552_v15, %v2349_v21  ;;  %v1055_v44 = vmul.f32 %v1553_v28, %v2347_v20  ;;  %v1589_v21 = vunpack.c.h.bf16 %v1805_v24  ;;  %v1810_v15 = vld [vmem:[%s2309_s24 + $0x88] sm:$0xff]  }
  0xf6   : > { %789 = vbcast.lane.b32.xlu1 %v2345_v19, 264  ;;  %785 = vbcast.lane.b32.xlu0 %v2345_v19, 256 }
  0xf7   : > { %v1180_v29 = vadd.f32 %v1179_v8, %v1053_v7 }
  0xf8   : > { %v2353_v22 = vpop.permute.xlu1 %553  ;;  %v2355_v23 = vpop.permute.xlu0 %549 }
  0xf9   : > { %v1181_v45 = vadd.f32 %v1180_v29, %v1054_v37 }
  0xfa   : > { %797 = vbcast.lane.b32.xlu1 %v2345_v19, 280  ;;  %793 = vbcast.lane.b32.xlu0 %v2345_v19, 272 }
  0xfb   : > { %v1182_v53 = vadd.f32 %v1181_v45, %v1055_v44 }
  0xfc   : > { %v2360_v26 = vpop.permute.xlu1 %561  ;;  %v2362_v27 = vpop.permute.xlu0 %557 }
  0xfe   : > { %805 = vbcast.lane.b32.xlu1 %v2345_v19, 296  ;;  %801 = vbcast.lane.b32.xlu0 %v2345_v19, 288 }
 0x100   : > { %v2367_v32 = vpop.permute.xlu1 %569  ;;  %v2369_v33 = vpop.permute.xlu0 %565 }
 0x102   : > { %813 = vbcast.lane.b32.xlu1 %v2345_v19, 312  ;;  %809 = vbcast.lane.b32.xlu0 %v2345_v19, 304 }
 0x104   : > { %v2374_v39 = vpop.permute.xlu1 %577  ;;  %v2376_v40 = vpop.permute.xlu0 %573 }
 0x106   : > { %821 = vbcast.lane.b32.xlu1 %v2345_v19, 328  ;;  %817 = vbcast.lane.b32.xlu0 %v2345_v19, 320 }
 0x108   : > { %v589_v47 = vpop.permute.xlu1 %588  ;;  %v585_v48 = vpop.permute.xlu0 %584 }
 0x109   : > { %v1065_v49 = vmul.f32 %v1573_v41, %v589_v47  ;;  %v1064_v50 = vmul.f32 %v1572_v42, %v585_v48  ;;  %v983_v42 = vsub.s32 7, %v2328_v2  ;;  %v1556_v48 = vunpack.c.l.bf16 %v1797_v38 }
 0x10a   : > { %829 = vbcast.lane.b32.xlu1 %v2345_v19, 344  ;;  %825 = vbcast.lane.b32.xlu0 %v2345_v19, 336  ;;  %v1557_v2 = vunpack.c.h.bf16 %v1797_v38  ;;  %v1811_v38 = vld [vmem:[%s2309_s24 + $0x90] sm:$0xff]  }
 0x10b   : > { %v1197_v60 = vadd.f32 %v1065_v49, %v1064_v50  ;;  %v1056_v55 = vmul.f32 %v1556_v48, %v2355_v23  ;;  %v1809_v23 = vld [vmem:[%s2309_s24 + $0x80] sm:$0xff]   ;;  %v1613_v48 = vunpack.c.h.bf16 %v1811_v38 }
 0x10c   : > { %v597_v57 = vpop.permute.xlu1 %596  ;;  %v593_v58 = vpop.permute.xlu0 %592 }
 0x10d   : > { %v1067_v61 = vmul.f32 %v1577_v51, %v597_v57  ;;  %v1066_v62 = vmul.f32 %v1576_v52, %v593_v58  ;;  %v2410_v51 = vrot.slane %v2331_v3, %v983_v42  ;;  %v1806_v52 = vld [vmem:[%s2309_s24 + $0x68] sm:$0xff]  }
 0x10e   : > { %837 = vbcast.lane.b32.xlu1 %v2345_v19, 360  ;;  %833 = vbcast.lane.b32.xlu0 %v2345_v19, 352  ;;  %v1592_v58 = vunpack.c.l.bf16 %v1806_v52  ;;  %v1593_v0 = vunpack.c.h.bf16 %v1806_v52 }
 0x10f   : > { %v1198_v6 = vadd.f32 %v1197_v60, %v1066_v62  ;;  %v1183_v60 = vadd.f32 %v1182_v53, %v1056_v55 }
 0x110   : > { %v605_v9 = vpop.permute.xlu1 %604  ;;  %v601_v10 = vpop.permute.xlu0 %600 }
 0x111   : > { %v1069_v11 = vmul.f32 %v1581_v63, %v605_v9  ;;  %v1068_v12 = vmul.f32 %v1580_v59, %v601_v10  ;;  %v1199_v13 = vadd.f32 %v1198_v6, %v1067_v61  ;;  %v1798_v59 = vld [vmem:[%s2309_s24 + $0x28] sm:$0xff]   ;;  %v1605_v9 = vunpack.c.h.bf16 %v1809_v23 }
 0x112   : > { %845 = vbcast.lane.b32.xlu1 %v2345_v19, 376  ;;  %841 = vbcast.lane.b32.xlu0 %v2345_v19, 368  ;;  %v2403_v19 = vrot.slane %v2331_v3, %v916_v17  ;;  %v1057_v3 = vmul.f32 %v1557_v2, %v2353_v22  ;;  %v1560_v63 = vunpack.c.l.bf16 %v1798_v59  ;;  %v1561_v6 = vunpack.c.h.bf16 %v1798_v59 }
 0x113   : > { %v1200_v25 = vadd.f32 %v1199_v13, %v1068_v12  ;;  %v1604_v10 = vunpack.c.l.bf16 %v1809_v23 }
 0x114   : > { %v613_v30 = vpop.permute.xlu1 %612  ;;  %v609_v31 = vpop.permute.xlu0 %608  ;;  %v1184_v7 = vadd.f32 %v1183_v60, %v1057_v3  ;;  %v1059_v24 = vmul.f32 %v1561_v6, %v2360_v26 }
 0x115   : > { %v1070_v34 = vmul.f32 %v1584_v14, %v609_v31  ;;  %v1201_v35 = vadd.f32 %v1200_v25, %v1069_v11  ;;  %v1071_v41 = vmul.f32 %v1585_v16, %v613_v30  ;;  %v1058_v11 = vmul.f32 %v1560_v63, %v2362_v27  ;;  %v1799_v16 = vld [vmem:[%s2309_s24 + $0x30] sm:$0xff]  }
 0x116   : > { %856 = vbcast.lane.b32.xlu1 %v2394_v18, 264  ;;  %852 = vbcast.lane.b32.xlu0 %v2394_v18, 256  ;;  %v1596_v14 = vunpack.c.l.bf16 %v1807_v5  ;;  %v1609_v31 = vunpack.c.h.bf16 %v1810_v15  ;;  %v1608_v27 = vunpack.c.l.bf16 %v1810_v15  ;;  %v1565_v26 = vunpack.c.h.bf16 %v1799_v16 }
 0x117   : > { %v1202_v43 = vadd.f32 %v1201_v35, %v1070_v34  ;;  %v1185_v17 = vadd.f32 %v1184_v7, %v1058_v11  ;;  %v1564_v34 = vunpack.c.l.bf16 %v1799_v16  ;;  %v1597_v35 = vunpack.c.h.bf16 %v1807_v5 }
 0x118   : > { %v621_v46 = vpop.permute.xlu1 %620  ;;  %v617_v47 = vpop.permute.xlu0 %616  ;;  %v1061_v55 = vmul.f32 %v1565_v26, %v2367_v32 }
 0x119   : > { %v1072_v49 = vmul.f32 %v1588_v36, %v617_v47  ;;  %v1203_v50 = vadd.f32 %v1202_v43, %v1071_v41  ;;  %v1073_v56 = vmul.f32 %v1589_v21, %v621_v46  ;;  %v1808_v41 = vld [vmem:[%s2309_s24 + $0x78] sm:$0xff]   ;;  %v1186_v43 = vadd.f32 %v1185_v17, %v1059_v24 }
 0x11a   : > { %919 = vbcast.lane.b32.xlu1 %v2403_v19, 256  ;;  %860 = vbcast.lane.b32.xlu0 %v2394_v18, 272  ;;  %v1612_v21 = vunpack.c.l.bf16 %v1811_v38  ;;  %v1600_v53 = vunpack.c.l.bf16 %v1808_v41 }
 0x11b   : > { %v1204_v57 = vadd.f32 %v1203_v50, %v1072_v49  ;;  %v1812_v49 = vld [vmem:[%s2309_s24 + $0x98] sm:$0xff]   ;;  %v1060_v50 = vmul.f32 %v1564_v34, %v2369_v33 }
 0x11c   : > { %v629_v54 = vpop.permute.xlu1 %628  ;;  %v625_v20 = vpop.permute.xlu0 %624  ;;  %v1616_v59 = vunpack.c.l.bf16 %v1812_v49  ;;  %v1617_v33 = vunpack.c.h.bf16 %v1812_v49 }
 0x11d   : > { %v1074_v1 = vmul.f32 %v1592_v58, %v625_v20  ;;  %v1205_v4 = vadd.f32 %v1204_v57, %v1073_v56  ;;  %v1075_v12 = vmul.f32 %v1593_v0, %v629_v54  ;;  %v1800_v54 = vld [vmem:[%s2309_s24 + $0x38] sm:$0xff]   ;;  %v1187_v56 = vadd.f32 %v1186_v43, %v1060_v50 }
 0x11e   : > { %986 = vbcast.lane.b32.xlu1 %v2410_v51, 256  ;;  %923 = vbcast.lane.b32.xlu0 %v2403_v19, 264  ;;  %v1568_v63 = vunpack.c.l.bf16 %v1800_v54  ;;  %v1601_v0 = vunpack.c.h.bf16 %v1808_v41  ;;  %v1569_v32 = vunpack.c.h.bf16 %v1800_v54 }
 0x11f   : > { %v1206_v13 = vadd.f32 %v1205_v4, %v1074_v1  ;;  %v1188_v5 = vadd.f32 %v1187_v56, %v1061_v55 }
 0x120   : > { %v637_v61 = vpop.permute.xlu1 %636  ;;  %v633_v62 = vpop.permute.xlu0 %632  ;;  %v1062_v15 = vmul.f32 %v1568_v63, %v2376_v40  ;;  %v1063_v17 = vmul.f32 %v1569_v32, %v2374_v39  ;;  %v1815_v40 = vld [vmem:[%s2309_s24 + $0xb0] sm:$0xff]   ;;  %v1818_v63 = vld [vmem:[%s2309_s24 + $0xc8] sm:$0xff]  }
 0x121   : > { %v1076_v36 = vmul.f32 %v1596_v14, %v633_v62  ;;  %v1207_v37 = vadd.f32 %v1206_v13, %v1075_v12  ;;  %v1077_v52 = vmul.f32 %v1597_v35, %v637_v61  ;;  %v1813_v61 = vld [vmem:[%s2309_s24 + $0xa0] sm:$0xff]   ;;  %v1814_v14 = vld [vmem:[%s2309_s24 + $0xa8] sm:$0xff]   ;;  %v1628_v39 = vunpack.c.l.bf16 %v1815_v40 }
 0x122   : > { %927 = vbcast.lane.b32.xlu1 %v2403_v19, 272  ;;  %990 = vbcast.lane.b32.xlu0 %v2410_v51, 264  ;;  %v1621_v13 = vunpack.c.h.bf16 %v1813_v61  ;;  %v1625_v35 = vunpack.c.h.bf16 %v1814_v14 }
 0x123   : > { %v1208_v2 = vadd.f32 %v1207_v37, %v1076_v36 }
 0x124   : > { %v2422_v8 = vpop.permute.xlu1 %644  ;;  %v641_v22 = vpop.permute.xlu0 %640 }
 0x125   : > { %v1078_v1 = vmul.f32 %v1600_v53, %v641_v22  ;;  %v1209_v4 = vadd.f32 %v1208_v2, %v1077_v52  ;;  %v1079_v22 = vmul.f32 %v1601_v0, %v2422_v8 }
 0x126   : > { %994 = vbcast.lane.b32.xlu1 %v2410_v51, 272  ;;  %864 = vbcast.lane.b32.xlu0 %v2394_v18, 280 }
 0x127   : > { %v1210_v16 = vadd.f32 %v1209_v4, %v1078_v1 }
 0x128   : > { %v656_v25 = vpop.permute.xlu1 %655  ;;  %v652_v28 = vpop.permute.xlu0 %651 }
 0x129   : > { %v1081_v29 = vmul.f32 %v1605_v9, %v656_v25  ;;  %v1080_v30 = vmul.f32 %v1604_v10, %v652_v28  ;;  %v1620_v9 = vunpack.c.l.bf16 %v1813_v61  ;;  %v1189_v25 = vadd.f32 %v1188_v5, %v1062_v15 }
 0x12a   : > { %868 = vbcast.lane.b32.xlu1 %v2394_v18, 288  ;;  %931 = vbcast.lane.b32.xlu0 %v2403_v19, 280  ;;  %v1211_v36 = vadd.f32 %v1210_v16, %v1079_v22  ;;  %v1640_v5 = vunpack.c.l.bf16 %v1818_v63 }
 0x12b   : > { %v1218_v42 = vadd.f32 %v1081_v29, %v1080_v30  ;;  %v1624_v30 = vunpack.c.l.bf16 %v1814_v14  ;;  %v1190_v37 = vadd.f32 %v1189_v25, %v1063_v17 }
 0x12c   : > { %v664_v44 = vpop.permute.xlu1 %663  ;;  %v660_v45 = vpop.permute.xlu0 %659 }
 0x12d   : > { %v1083_v46 = vmul.f32 %v1609_v31, %v664_v44  ;;  %v1082_v47 = vmul.f32 %v1608_v27, %v660_v45  ;;  %v1629_v44 = vunpack.c.h.bf16 %v1815_v40  ;;  %v1816_v45 = vld [vmem:[%s2309_s24 + $0xb8] sm:$0xff]  }
 0x12e   : > { %935 = vbcast.lane.b32.xlu1 %v2403_v19, 288  ;;  %998 = vbcast.lane.b32.xlu0 %v2410_v51, 280  ;;  %v1632_v50 = vunpack.c.l.bf16 %v1816_v45  ;;  %v1633_v54 = vunpack.c.h.bf16 %v1816_v45 }
 0x12f   : > { %v1219_v20 = vadd.f32 %v1218_v42, %v1082_v47 }
 0x130   : > { %v672_v57 = vpop.permute.xlu1 %671  ;;  %v668_v58 = vpop.permute.xlu0 %667 }
 0x131   : > { %v1085_v3 = vmul.f32 %v1613_v48, %v672_v57  ;;  %v1084_v60 = vmul.f32 %v1612_v21, %v668_v58  ;;  %v1220_v62 = vadd.f32 %v1219_v20, %v1083_v46  ;;  %v1212_v46 = vrot.slane %v1211_v36, 4  ;;  %v1817_v20 = vld [vmem:[%s2309_s24 + $0xc0] sm:$0xff]  }
 0x132   : > { %1002 = vbcast.lane.b32.xlu1 %v2410_v51, 288  ;;  %872 = vbcast.lane.b32.xlu0 %v2394_v18, 296  ;;  %v1191_v48 = vrot.slane %v1190_v37, 4  ;;  %v1636_v61 = vunpack.c.l.bf16 %v1817_v20 }
 0x133   : > { %v1221_v23 = vadd.f32 %v1220_v62, %v1084_v60  ;;  %v1213_v55 = vadd.f32 %v1212_v46, %v1211_v36 }
 0x134   : > { %v680_v6 = vpop.permute.xlu1 %679  ;;  %v676_v7 = vpop.permute.xlu0 %675  ;;  %v1192_v57 = vadd.f32 %v1191_v48, %v1190_v37 }
 0x135   : > { %v1087_v10 = vmul.f32 %v1617_v33, %v680_v6  ;;  %v1086_v11 = vmul.f32 %v1616_v59, %v676_v7  ;;  %v1222_v12 = vadd.f32 %v1221_v23, %v1085_v3  ;;  %v1637_v3 = vunpack.c.h.bf16 %v1817_v20 }
 0x136   : > { %876 = vbcast.lane.b32.xlu1 %v2394_v18, 304  ;;  %939 = vbcast.lane.b32.xlu0 %v2403_v19, 296  ;;  %v1214_v0 = vrot.slane %v1213_v55, 2  ;;  %v1193_v4 = vrot.slane %v1192_v57, 2 }
 0x137   : > { %v1223_v24 = vadd.f32 %v1222_v12, %v1086_v11  ;;  %v1819_v11 = vld [vmem:[%s2309_s24 + $0xd0] sm:$0xff]  }
 0x138   : > { %v688_v28 = vpop.permute.xlu1 %687  ;;  %v684_v29 = vpop.permute.xlu0 %683  ;;  %v1215_v12 = vadd.f32 %v1214_v0, %v1213_v55  ;;  %v1194_v15 = vadd.f32 %v1193_v4, %v1192_v57 }
 0x139   : > { %v1089_v31 = vmul.f32 %v1621_v13, %v688_v28  ;;  %v1088_v27 = vmul.f32 %v1620_v9, %v684_v29  ;;  %v1224_v34 = vadd.f32 %v1223_v24, %v1087_v10  ;;  %v1641_v10 = vunpack.c.h.bf16 %v1818_v63 }
 0x13a   : > { %943 = vbcast.lane.b32.xlu1 %v2403_v19, 304  ;;  %1006 = vbcast.lane.b32.xlu0 %v2410_v51, 296  ;;  %v1644_v24 = vunpack.c.l.bf16 %v1819_v11  ;;  %v1645_v29 = vunpack.c.h.bf16 %v1819_v11 }
 0x13b   : > { %v1225_v8 = vadd.f32 %v1224_v34, %v1088_v27 }
 0x13c   : > { %v696_v38 = vpop.permute.xlu1 %695  ;;  %v692_v41 = vpop.permute.xlu0 %691 }
 0x13d   : > { %v1091_v42 = vmul.f32 %v1625_v35, %v696_v38  ;;  %v1090_v26 = vmul.f32 %v1624_v30, %v692_v41  ;;  %v1226_v43 = vadd.f32 %v1225_v8, %v1089_v31  ;;  %v1820_v30 = vld [vmem:[%s2309_s24 + $0xd8] sm:$0xff]   ;;  %v1216_v31 = vrot.slane %v1215_v12, 1 }
 0x13e   : > { %1010 = vbcast.lane.b32.xlu1 %v2410_v51, 304  ;;  %880 = vbcast.lane.b32.xlu0 %v2394_v18, 312  ;;  %v1195_v35 = vrot.slane %v1194_v15, 1  ;;  %v1649_v8 = vunpack.c.h.bf16 %v1820_v30  ;;  %v1648_v37 = vunpack.c.l.bf16 %v1820_v30 }
 0x13f   : > { %v1227_v47 = vadd.f32 %v1226_v43, %v1090_v26  ;;  %v1821_v26 = vld [vmem:[%s2309_s24 + $0xe0] sm:$0xff]   ;;  %v1217_v43 = vadd.f32 %v1216_v31, %v1215_v12 }
 0x140   : > { %v704_v21 = vpop.permute.xlu1 %703  ;;  %v700_v49 = vpop.permute.xlu0 %699  ;;  %v1196_v46 = vadd.f32 %v1195_v35, %v1194_v15 }
 0x141   : > { %v1093_v52 = vmul.f32 %v1629_v44, %v704_v21  ;;  %v1092_v2 = vmul.f32 %v1628_v39, %v700_v49  ;;  %v1228_v53 = vadd.f32 %v1227_v47, %v1091_v42  ;;  %v1653_v21 = vunpack.c.h.bf16 %v1821_v26 }
 0x142   : > { %884 = vbcast.lane.b32.xlu1 %v2394_v18, 320  ;;  %947 = vbcast.lane.b32.xlu0 %v2403_v19, 312  ;;  %v1652_v49 = vunpack.c.l.bf16 %v1821_v26  ;;  %v1353_v20 = vsel %vm1352_vm1, %v1217_v43, %v1196_v46 }
 0x143   : > { %v1229_v56 = vadd.f32 %v1228_v53, %v1092_v2 }
 0x144   : > { %v712_v58 = vpop.permute.xlu1 %711  ;;  %v708_v59 = vpop.permute.xlu0 %707 }
 0x145   : > { %v1095_v60 = vmul.f32 %v1633_v54, %v712_v58  ;;  %v1094_v62 = vmul.f32 %v1632_v50, %v708_v59  ;;  %v1230_v33 = vadd.f32 %v1229_v56, %v1093_v52  ;;  %v1822_v54 = vld [vmem:[%s2309_s24 + $0xe8] sm:$0xff]  }
 0x146   : > { %951 = vbcast.lane.b32.xlu1 %v2403_v19, 320  ;;  %1014 = vbcast.lane.b32.xlu0 %v2410_v51, 312  ;;  %v1656_v59 = vunpack.c.l.bf16 %v1822_v54 }
 0x147   : > { %v1231_v1 = vadd.f32 %v1230_v33, %v1094_v62  ;;  %v1657_v33 = vunpack.c.h.bf16 %v1822_v54 }
 0x148   : > { %v723_v23 = vpop.permute.xlu1 %722  ;;  %v719_v32 = vpop.permute.xlu0 %718 }
 0x149   : > { %v1232_v6 = vadd.f32 %v1231_v1, %v1095_v60  ;;  %v1097_v7 = vmul.f32 %v1637_v3, %v723_v23  ;;  %v1096_v9 = vmul.f32 %v1636_v61, %v719_v32  ;;  %v1823_v61 = vld [vmem:[%s2309_s24 + $0xf0] sm:$0xff]  }
 0x14a   : > { %1018 = vbcast.lane.b32.xlu1 %v2410_v51, 320  ;;  %888 = vbcast.lane.b32.xlu0 %v2394_v18, 328  ;;  %v1660_v4 = vunpack.c.l.bf16 %v1823_v61 }
 0x14b   : > { %v1233_v13 = vrot.slane %v1232_v6, 4  ;;  %v1239_v14 = vadd.f32 %v1097_v7, %v1096_v9  ;;  %v1824_v7 = vld [vmem:[%s2309_s24 + $0xf8] sm:$0xff]  }
 0x14c   : > { %v731_v22 = vpop.permute.xlu1 %730  ;;  %v727_v16 = vpop.permute.xlu0 %726  ;;  %v1664_v12 = vunpack.c.l.bf16 %v1824_v7 }
 0x14d   : > { %v1234_v17 = vadd.f32 %v1233_v13, %v1232_v6  ;;  %v1099_v25 = vmul.f32 %v1641_v10, %v731_v22  ;;  %v1098_v28 = vmul.f32 %v1640_v5, %v727_v16  ;;  %v1661_v6 = vunpack.c.h.bf16 %v1823_v61  ;;  %v1825_v16 = vld [vmem:[%s2309_s24 + $0x100] sm:$0xff]  }
 0x14e   : > { %892 = vbcast.lane.b32.xlu1 %v2394_v18, 336  ;;  %955 = vbcast.lane.b32.xlu0 %v2403_v19, 328  ;;  %v1665_v22 = vunpack.c.h.bf16 %v1824_v7 }
 0x14f   : > { %v1235_v27 = vrot.slane %v1234_v17, 2  ;;  %v1240_v34 = vadd.f32 %v1239_v14, %v1098_v28  ;;  %v1669_v28 = vunpack.c.h.bf16 %v1825_v16 }
 0x150   : > { %v739_v40 = vpop.permute.xlu1 %738  ;;  %v735_v36 = vpop.permute.xlu0 %734 }
 0x151   : > { %v1236_v38 = vadd.f32 %v1235_v27, %v1234_v17  ;;  %v1101_v41 = vmul.f32 %v1645_v29, %v739_v40  ;;  %v1100_v39 = vmul.f32 %v1644_v24, %v735_v36  ;;  %v1241_v42 = vadd.f32 %v1240_v34, %v1099_v25  ;;  %v1826_v34 = vld [vmem:[%s2309_s24 + $0x108] sm:$0xff]  }
 0x152   : > { %959 = vbcast.lane.b32.xlu1 %v2403_v19, 336  ;;  %1022 = vbcast.lane.b32.xlu0 %v2410_v51, 328  ;;  %v1668_v27 = vunpack.c.l.bf16 %v1825_v16 }
 0x153   : > { %v1237_v44 = vrot.slane %v1236_v38, 1  ;;  %v1242_v45 = vadd.f32 %v1241_v42, %v1100_v39  ;;  %v1673_v39 = vunpack.c.h.bf16 %v1826_v34  ;;  %v1827_v42 = vld [vmem:[%s2309_s24 + $0x110] sm:$0xff]  }
 0x154   : > { %v747_v47 = vpop.permute.xlu1 %746  ;;  %v743_v48 = vpop.permute.xlu0 %742  ;;  %v1676_v46 = vunpack.c.l.bf16 %v1827_v42 }
 0x155   : > { %v1238_v50 = vadd.f32 %v1237_v44, %v1236_v38  ;;  %v1103_v52 = vmul.f32 %v1649_v8, %v747_v47  ;;  %v1102_v2 = vmul.f32 %v1648_v37, %v743_v48  ;;  %v1243_v53 = vadd.f32 %v1242_v45, %v1101_v41 }
 0x156   : > { %1026 = vbcast.lane.b32.xlu1 %v2410_v51, 336  ;;  %896 = vbcast.lane.b32.xlu0 %v2394_v18, 344  ;;  %v1672_v8 = vunpack.c.l.bf16 %v1826_v34 }
 0x157   : > { %v2473_v55 = vsel %vm1354_vm2, %v1238_v50, %v1353_v20  ;;  %v1244_v56 = vadd.f32 %v1243_v53, %v1102_v2  ;;  %v1828_v50 = vld [vmem:[%s2309_s24 + $0x118] sm:$0xff]  }
 0x158   : > { %v755_v57 = vpop.permute.xlu1 %754  ;;  %v751_v58 = vpop.permute.xlu0 %750  ;;  %v1681_v20 = vunpack.c.h.bf16 %v1828_v50 }
 0x159   : > { %v1105_v3 = vmul.f32 %v1653_v21, %v755_v57  ;;  %v1104_v60 = vmul.f32 %v1652_v49, %v751_v58  ;;  %v1245_v62 = vadd.f32 %v1244_v56, %v1103_v52  ;;  %v1677_v49 = vunpack.c.h.bf16 %v1827_v42 }
 0x15a   : > { %900 = vbcast.lane.b32.xlu1 %v2394_v18, 352  ;;  %963 = vbcast.lane.b32.xlu0 %v2403_v19, 344  ;;  %v1680_v56 = vunpack.c.l.bf16 %v1828_v50 }
 0x15b   : > { %v1246_v63 = vadd.f32 %v1245_v62, %v1104_v60  ;;  %v1829_v60 = vld [vmem:[%s2309_s24 + $0x120] sm:$0xff]  }
 0x15c   : > { %v763_v0 = vpop.permute.xlu1 %762  ;;  %v759_v1 = vpop.permute.xlu0 %758 }
 0x15d   : > { %v1107_v23 = vmul.f32 %v1657_v33, %v763_v0  ;;  %v1106_v32 = vmul.f32 %v1656_v59, %v759_v1  ;;  %v1247_v5 = vadd.f32 %v1246_v63, %v1105_v3  ;;  %v1685_v63 = vunpack.c.h.bf16 %v1829_v60 }
 0x15e   : > { %967 = vbcast.lane.b32.xlu1 %v2403_v19, 352  ;;  %1030 = vbcast.lane.b32.xlu0 %v2410_v51, 344  ;;  %v1684_v0 = vunpack.c.l.bf16 %v1829_v60 }
 0x15f   : > { %v1248_v9 = vadd.f32 %v1247_v5, %v1106_v32  ;;  %v1830_v5 = vld [vmem:[%s2309_s24 + $0x128] sm:$0xff]  }
 0x160   : > { %v771_v10 = vpop.permute.xlu1 %770  ;;  %v767_v11 = vpop.permute.xlu0 %766 }
 0x161   : > { %v1109_v13 = vmul.f32 %v1661_v6, %v771_v10  ;;  %v1108_v14 = vmul.f32 %v1660_v4, %v767_v11  ;;  %v1249_v15 = vadd.f32 %v1248_v9, %v1107_v23 }
 0x162   : > { %1034 = vbcast.lane.b32.xlu1 %v2410_v51, 352  ;;  %904 = vbcast.lane.b32.xlu0 %v2394_v18, 360 }
 0x163   : > { %v1250_v24 = vadd.f32 %v1249_v15, %v1108_v14  ;;  %v1831_v14 = vld [vmem:[%s2309_s24 + $0x130] sm:$0xff]  }
 0x164   : > { %v779_v17 = vpop.permute.xlu1 %778  ;;  %v775_v25 = vpop.permute.xlu0 %774 }
 0x165   : > { %v1111_v29 = vmul.f32 %v1665_v22, %v779_v17  ;;  %v1110_v30 = vmul.f32 %v1664_v12, %v775_v25  ;;  %v1251_v31 = vadd.f32 %v1250_v24, %v1109_v13  ;;  %v1689_v13 = vunpack.c.h.bf16 %v1830_v5 }
 0x166   : > { %908 = vbcast.lane.b32.xlu1 %v2394_v18, 368  ;;  %971 = vbcast.lane.b32.xlu0 %v2403_v19, 360  ;;  %v1692_v24 = vunpack.c.l.bf16 %v1831_v14 }
 0x167   : > { %v1252_v35 = vadd.f32 %v1251_v31, %v1110_v30  ;;  %v1832_v30 = vld [vmem:[%s2309_s24 + $0x138] sm:$0xff]  }
 0x168   : > { %v790_v40 = vpop.permute.xlu1 %789  ;;  %v786_v36 = vpop.permute.xlu0 %785  ;;  %v1696_v34 = vunpack.c.l.bf16 %v1832_v30 }
 0x169   : > { %v1253_v37 = vadd.f32 %v1252_v35, %v1111_v29  ;;  %v1113_v38 = vmul.f32 %v1669_v28, %v790_v40  ;;  %v1112_v41 = vmul.f32 %v1668_v27, %v786_v36  ;;  %v1693_v29 = vunpack.c.h.bf16 %v1831_v14  ;;  %v1841_v14 = vld [vmem:[%s2309_s24 + $0x180] sm:$0xff]  }
 0x16a   : > { %975 = vbcast.lane.b32.xlu1 %v2403_v19, 368  ;;  %1038 = vbcast.lane.b32.xlu0 %v2410_v51, 360 }
 0x16b   : > { %v1254_v26 = vrot.slane %v1253_v37, 4  ;;  %v1260_v43 = vadd.f32 %v1113_v38, %v1112_v41 }
 0x16c   : > { %v798_v44 = vpop.permute.xlu1 %797  ;;  %v794_v45 = vpop.permute.xlu0 %793 }
 0x16d   : > { %v1255_v47 = vadd.f32 %v1254_v26, %v1253_v37  ;;  %v1115_v48 = vmul.f32 %v1673_v39, %v798_v44  ;;  %v1114_v21 = vmul.f32 %v1672_v8, %v794_v45  ;;  %v1697_v8 = vunpack.c.h.bf16 %v1832_v30 }
 0x16e   : > { %1042 = vbcast.lane.b32.xlu1 %v2410_v51, 368  ;;  %912 = vbcast.lane.b32.xlu0 %v2394_v18, 376 }
 0x16f   : > { %v1256_v52 = vrot.slane %v1255_v47, 2  ;;  %v1261_v2 = vadd.f32 %v1260_v43, %v1114_v21 }
 0x170   : > { %v806_v53 = vpop.permute.xlu1 %805  ;;  %v802_v54 = vpop.permute.xlu0 %801 }
 0x171   : > { %v1257_v57 = vadd.f32 %v1256_v52, %v1255_v47  ;;  %v1117_v58 = vmul.f32 %v1677_v49, %v806_v53  ;;  %v1116_v59 = vmul.f32 %v1676_v46, %v802_v54  ;;  %v1262_v3 = vadd.f32 %v1261_v2, %v1115_v48  ;;  %v1971_v54 = vld [vmem:[%s2315_s20] sm:$0xff] }
 0x172   : > { %1046 = vbcast.lane.b32.xlu1 %v2410_v51, 376  ;;  %979 = vbcast.lane.b32.xlu0 %v2403_v19, 376  ;;  %v1688_v19 = vunpack.c.l.bf16 %v1830_v5 }
 0x173   : > { %v1258_v62 = vrot.slane %v1257_v57, 1  ;;  %v1263_v33 = vadd.f32 %v1262_v3, %v1116_v59 }
 0x174   : > { %v814_v18 = vpop.permute.xlu1 %813  ;;  %v810_v61 = vpop.permute.xlu0 %809 }
 0x175   : > { %v1259_v1 = vadd.f32 %v1258_v62, %v1257_v57  ;;  %v1119_v4 = vmul.f32 %v1681_v20, %v814_v18  ;;  %v1118_v23 = vmul.f32 %v1680_v56, %v810_v61  ;;  %v1264_v32 = vadd.f32 %v1263_v33, %v1117_v58 }
 0x177   : > { %v1357_v6 = vsel %vm1356_vm3, %v1259_v1, %v2473_v55  ;;  %v1265_v7 = vadd.f32 %v1264_v32, %v1118_v23 }
 0x178   : > { %v822_v9 = vpop.permute.xlu1 %821  ;;  %v818_v51 = vpop.permute.xlu0 %817 }
 0x179   : > { %v1121_v10 = vmul.f32 %v1685_v63, %v822_v9  ;;  %v1120_v11 = vmul.f32 %v1684_v0, %v818_v51  ;;  %v1266_v12 = vadd.f32 %v1265_v7, %v1119_v4 }
 0x17b   : > { %v1267_v15 = vadd.f32 %v1266_v12, %v1120_v11 }
 0x17c   : > { %v830_v22 = vpop.permute.xlu1 %829  ;;  %v826_v16 = vpop.permute.xlu0 %825 }
 0x17d   : > { %v1123_v17 = vmul.f32 %v1689_v13, %v830_v22  ;;  %v1122_v25 = vmul.f32 %v1688_v19, %v826_v16  ;;  %v1268_v28 = vadd.f32 %v1267_v15, %v1121_v10  ;;  %v1833_v10 = vld [vmem:[%s2309_s24 + $0x140] sm:$0xff]   ;;  %v1834_v13 = vld [vmem:[%s2309_s24 + $0x148] sm:$0xff]  }
 0x17e   : > { %v1849_v15 = vld [vmem:[%s2309_s24 + $0x1c0] sm:$0xff]   ;;  %v1842_v22 = vld [vmem:[%s2309_s24 + $0x188] sm:$0xff]   ;;  %v1701_v16 = vunpack.c.h.bf16 %v1833_v10 }
 0x17f   : > { %v1269_v55 = vadd.f32 %v1268_v28, %v1122_v25  ;;  %v1835_v25 = vld [vmem:[%s2309_s24 + $0x150] sm:$0xff]   ;;  %v1704_v28 = vunpack.c.l.bf16 %v1834_v13 }
 0x180   : > { %v838_v31 = vpop.permute.xlu1 %837  ;;  %v834_v27 = vpop.permute.xlu0 %833 }
 0x181   : > { %v1125_v35 = vmul.f32 %v1693_v29, %v838_v31  ;;  %v1124_v40 = vmul.f32 %v1692_v24, %v834_v27  ;;  %v1270_v36 = vadd.f32 %v1269_v55, %v1123_v17  ;;  %v1700_v24 = vunpack.c.l.bf16 %v1833_v10  ;;  %v1850_v17 = vld [vmem:[%s2309_s24 + $0x1c8] sm:$0xff]   ;;  %v2567_v29 = vld [vmem:[%s2309_s24 + $0x190] sm:$0xff]  }
 0x182   : > { %v1732_v31 = vunpack.c.l.bf16 %v1841_v14  ;;  %v1764_v27 = vunpack.c.l.bf16 %v1849_v15 }
 0x183   : > { %v1271_v37 = vadd.f32 %v1270_v36, %v1124_v40  ;;  %v2574_v40 = vld [vmem:[%s2309_s24 + $0x1d0] sm:$0xff]   ;;  %v2577_v36 = vld [vmem:[%s2309_s24 + $0x158] sm:$0xff]  }
 0x184   : > { %v846_v38 = vpop.permute.xlu1 %845  ;;  %v842_v41 = vpop.permute.xlu0 %841 }
 0x185   : > { %v1127_v39 = vmul.f32 %v1697_v8, %v846_v38  ;;  %v1126_v42 = vmul.f32 %v1696_v34, %v842_v41  ;;  %v1272_v26 = vadd.f32 %v1271_v37, %v1125_v35  ;;  %v1733_v34 = vunpack.c.h.bf16 %v1841_v14  ;;  %v2599_v14 = vld [vmem:[%s2309_s24 + $0x160] sm:$0xff]  }
 0x186   : > { %v1736_v35 = vunpack.c.l.bf16 %v1842_v22  ;;  %v1765_v8 = vunpack.c.h.bf16 %v1849_v15  ;;  %v1768_v37 = vunpack.c.l.bf16 %v1850_v17  ;;  %v1705_v38 = vunpack.c.h.bf16 %v1834_v13  ;;  %v2602_v15 = vld [vmem:[%s2309_s24 + $0x1a0] sm:$0xff]  }
 0x187   : > { %v1273_v43 = vadd.f32 %v1272_v26, %v1126_v42  ;;  %v1708_v41 = vunpack.c.l.bf16 %v1835_v25  ;;  %v1773_v13 = vunpack.c.h.bf16 %v2574_v40 }
 0x188   : > { %v2500_v44 = vpop.permute.xlu1 %856  ;;  %v2502_v45 = vpop.permute.xlu0 %852 }
 0x189   : > { %v1274_v46 = vadd.f32 %v1273_v43, %v1127_v39  ;;  %v2580_v39 = vld [vmem:[%s2309_s24 + $0x198] sm:$0xff]   ;;  %v1129_v42 = vmul.f32 %v1701_v16, %v2500_v44  ;;  %v1128_v26 = vmul.f32 %v1700_v24, %v2502_v45  ;;  %v1737_v43 = vunpack.c.h.bf16 %v1842_v22 }
 0x18a   : > { %v1741_v45 = vunpack.c.h.bf16 %v2567_v29  ;;  %v1744_v10 = vunpack.c.l.bf16 %v2580_v39 }
 0x18b   : > { %v1275_v47 = vrot.slane %v1274_v46, 4 }
 0x18c   : > { %v2504_v48 = vpop.permute.xlu1 %919  ;;  %v2506_v21 = vpop.permute.xlu0 %860 }
 0x18d   : > { %v1276_v49 = vadd.f32 %v1275_v47, %v1274_v46  ;;  %v1740_v46 = vunpack.c.l.bf16 %v2567_v29  ;;  %v2586_v47 = vld [vmem:[%s2309_s24 + $0x1d8] sm:$0xff]   ;;  %v1130_v44 = vmul.f32 %v1704_v28, %v2506_v21  ;;  %v1144_v22 = vmul.f32 %v1732_v31, %v2504_v48 }
 0x18e   : > { %v1776_v24 = vunpack.c.l.bf16 %v2586_v47  ;;  %v1281_v21 = vadd.f32 %v1129_v42, %v1128_v26  ;;  %v1716_v48 = vunpack.c.l.bf16 %v2599_v14  ;;  %v1748_v31 = vunpack.c.l.bf16 %v2602_v15 }
 0x18f   : > { %v1277_v50 = vrot.slane %v1276_v49, 2 }
 0x190   : > { %v2508_v52 = vpop.permute.xlu1 %986  ;;  %v2510_v2 = vpop.permute.xlu0 %923 }
 0x191   : > { %v1278_v53 = vadd.f32 %v1277_v50, %v1276_v49  ;;  %1370 = vadd.xlane.f32.xlu0 %v1971_v54  ;;  %v1769_v49 = vunpack.c.h.bf16 %v1850_v17  ;;  %v1772_v50 = vunpack.c.l.bf16 %v2574_v40  ;;  %v1712_v54 = vunpack.c.l.bf16 %v2577_v36  ;;  %v2612_v40 = vld [vmem:[%s2309_s24 + $0x1e0] sm:$0xff]  }
 0x192   : > { %v1145_v16 = vmul.f32 %v1733_v34, %v2510_v2  ;;  %v1713_v17 = vunpack.c.h.bf16 %v2577_v36  ;;  %v1745_v2 = vunpack.c.h.bf16 %v2580_v39  ;;  %v1717_v39 = vunpack.c.h.bf16 %v2599_v14 }
 0x193   : > { %v1279_v20 = vrot.slane %v1278_v53, 1 }
 0x194   : > { %v2513_v56 = vpop.permute.xlu1 %927  ;;  %v2515_v57 = vpop.permute.xlu0 %990 }
 0x195   : > { %v1280_v58 = vadd.f32 %v1279_v20, %v1278_v53  ;;  %v1709_v53 = vunpack.c.h.bf16 %v1835_v25  ;;  %v1160_v25 = vmul.f32 %v1764_v27, %v2508_v52  ;;  %v1161_v28 = vmul.f32 %v1765_v8, %v2515_v57  ;;  %v2626_v8 = vld [vmem:[%s2309_s24 + $0x168] sm:$0xff]  }
 0x196   : > { %v1282_v52 = vadd.f32 %v1281_v21, %v1130_v44  ;;  %v1777_v27 = vunpack.c.h.bf16 %v2586_v47  ;;  %v1720_v47 = vunpack.c.l.bf16 %v2626_v8 }
 0x197   : > { %v2517_v59 = vsel %vm1358_vm4, %v1280_v58, %v1357_v6  ;;  %v1323_v42 = vadd.f32 %v1161_v28, %v1160_v25 }
 0x198   : > { %2767 = vst [vmem:[#allocation22_spill] sm:$0xff] %v2517_v59  ;;  %v2519_v3 = vpop.permute.xlu1 %994  ;;  %v2521_v60 = vpop.permute.xlu0 %864  ;;  %v1146_v59 = vmul.f32 %v1736_v35, %v2513_v56  ;;  %v1302_v56 = vadd.f32 %v1145_v16, %v1144_v22 }
 0x199   : > { %v1131_v29 = vmul.f32 %v1705_v38, %v2521_v60  ;;  %v1162_v57 = vmul.f32 %v1768_v37, %v2519_v3  ;;  %v1780_v38 = vunpack.c.l.bf16 %v2612_v40  ;;  %v2634_v37 = vld [vmem:[%s2309_s24 + $0x1a8] sm:$0xff]  }
 0x19b   : > { %v1283_v26 = vadd.f32 %v1282_v52, %v1131_v29  ;;  %v1324_v22 = vadd.f32 %v1323_v42, %v1162_v57  ;;  %v1839_v29 = vld [vmem:[%s2309_s24 + $0x170] sm:$0xff]  }
 0x19c   : > { %v2523_v62 = vpop.permute.xlu1 %868  ;;  %v2525_v33 = vpop.permute.xlu0 %931  ;;  %v1855_v42 = vld [vmem:[%s2309_s24 + $0x1f0] sm:$0xff]  }
 0x19d   : > { %v1132_v60 = vmul.f32 %v1708_v41, %v2523_v62  ;;  %v1147_v35 = vmul.f32 %v1737_v43, %v2525_v33  ;;  %v1303_v62 = vadd.f32 %v1302_v56, %v1146_v59  ;;  %v1749_v33 = vunpack.c.h.bf16 %v2602_v15 }
 0x19f   : > { %v1284_v16 = vadd.f32 %v1283_v26, %v1132_v60  ;;  %v1304_v59 = vadd.f32 %v1303_v62, %v1147_v35  ;;  %v1840_v62 = vld [vmem:[%s2309_s24 + $0x178] sm:$0xff]  }
 0x1a0   : > { %v2527_v18 = vpop.permute.xlu1 %935  ;;  %v2529_v61 = vpop.permute.xlu0 %998 }
 0x1a1   : > { %v1163_v44 = vmul.f32 %v1769_v49, %v2529_v61  ;;  %v1148_v41 = vmul.f32 %v1740_v46, %v2527_v18  ;;  %v2646_v49 = vld [vmem:[%s2309_s24 + $0x1e8] sm:$0xff]   ;;  %v1752_v46 = vunpack.c.l.bf16 %v2634_v37 }
 0x1a3   : > { %v1325_v15 = vadd.f32 %v1324_v22, %v1163_v44 }
 0x1a4   : > { %v2531_v63 = vpop.permute.xlu1 %1002  ;;  %v2533_v0 = vpop.permute.xlu0 %872 }
 0x1a5   : > { %v1133_v3 = vmul.f32 %v1709_v53, %v2533_v0  ;;  %v1164_v61 = vmul.f32 %v1772_v50, %v2531_v63  ;;  %v1781_v53 = vunpack.c.h.bf16 %v2612_v40  ;;  %v1305_v63 = vadd.f32 %v1304_v59, %v1148_v41 }
 0x1a6   : > { %v1784_v50 = vunpack.c.l.bf16 %v2646_v49 }
 0x1a7   : > { %v1285_v21 = vadd.f32 %v1284_v16, %v1133_v3  ;;  %v1326_v52 = vadd.f32 %v1325_v15, %v1164_v61  ;;  %v1848_v16 = vld [vmem:[%s2309_s24 + $0x1b8] sm:$0xff]  }
 0x1a8   : > { %v2535_v1 = vpop.permute.xlu1 %876  ;;  %v2537_v4 = vpop.permute.xlu0 %939 }
 0x1a9   : > { %v1134_v0 = vmul.f32 %v1712_v54, %v2535_v1  ;;  %v1149_v18 = vmul.f32 %v1741_v45, %v2537_v4  ;;  %v1721_v54 = vunpack.c.h.bf16 %v2626_v8 }
 0x1ab   : > { %v1286_v40 = vadd.f32 %v1285_v21, %v1134_v0 }
 0x1ac   : > { %v2539_v23 = vpop.permute.xlu1 %943  ;;  %v2541_v32 = vpop.permute.xlu0 %1006 }
 0x1ad   : > { %v1165_v25 = vmul.f32 %v1773_v13, %v2541_v32  ;;  %v1150_v1 = vmul.f32 %v1744_v10, %v2539_v23  ;;  %v1847_v32 = vld [vmem:[%s2309_s24 + $0x1b0] sm:$0xff]   ;;  %v1306_v13 = vadd.f32 %v1305_v63, %v1149_v18  ;;  %v1753_v23 = vunpack.c.h.bf16 %v2634_v37  ;;  %v1856_v18 = vld [vmem:[%s2309_s24 + $0x1f8] sm:$0xff]  }
 0x1af   : > { %v1327_v10 = vadd.f32 %v1326_v52, %v1165_v25  ;;  %v1307_v26 = vadd.f32 %v1306_v13, %v1150_v1  ;;  %v1729_v52 = vunpack.c.h.bf16 %v1840_v62 }
 0x1b0   : > { %v2543_v5 = vpop.permute.xlu1 %1010  ;;  %v2545_v6 = vpop.permute.xlu0 %880 }
 0x1b1   : > { %v1135_v28 = vmul.f32 %v1713_v17, %v2545_v6  ;;  %v1166_v57 = vmul.f32 %v1776_v24, %v2543_v5  ;;  %v1724_v17 = vunpack.c.l.bf16 %v1839_v29  ;;  %v1756_v24 = vunpack.c.l.bf16 %v1847_v32 }
 0x1b3   : > { %v1287_v56 = vadd.f32 %v1286_v40, %v1135_v28 }
 0x1b4   : > { %v2547_v7 = vpop.permute.xlu1 %884  ;;  %v2549_v9 = vpop.permute.xlu0 %947 }
 0x1b5   : > { %v1136_v60 = vmul.f32 %v1716_v48, %v2547_v7  ;;  %v1151_v6 = vmul.f32 %v1745_v2, %v2549_v9  ;;  %v1785_v7 = vunpack.c.h.bf16 %v2646_v49  ;;  %v1328_v2 = vadd.f32 %v1327_v10, %v1166_v57 }
 0x1b6   : > { %v1793_v10 = vunpack.c.h.bf16 %v1856_v18 }
 0x1b7   : > { %v1288_v44 = vadd.f32 %v1287_v56, %v1136_v60  ;;  %v1761_v56 = vunpack.c.h.bf16 %v1848_v16 }
 0x1b8   : > { %v2551_v51 = vpop.permute.xlu1 %951  ;;  %v2553_v19 = vpop.permute.xlu0 %1014 }
 0x1b9   : > { %v1167_v8 = vmul.f32 %v1777_v27, %v2553_v19  ;;  %v1152_v5 = vmul.f32 %v1748_v31, %v2551_v51  ;;  %v1308_v19 = vadd.f32 %v1307_v26, %v1151_v6  ;;  %v1788_v27 = vunpack.c.l.bf16 %v1855_v42 }
 0x1bb   : > { %v1329_v51 = vadd.f32 %v1328_v2, %v1167_v8  ;;  %v1309_v61 = vadd.f32 %v1308_v19, %v1152_v5 }
 0x1bc   : > { %v2556_v11 = vpop.permute.xlu1 %1018  ;;  %v2558_v12 = vpop.permute.xlu0 %888 }
 0x1bd   : > { %v1137_v35 = vmul.f32 %v1717_v39, %v2558_v12  ;;  %v1168_v3 = vmul.f32 %v1780_v38, %v2556_v11  ;;  %v1725_v39 = vunpack.c.h.bf16 %v1839_v29  ;;  %v1728_v38 = vunpack.c.l.bf16 %v1840_v62 }
 0x1bf   : > { %v1289_v31 = vadd.f32 %v1288_v44, %v1137_v35  ;;  %v1330_v49 = vadd.f32 %v1329_v51, %v1168_v3 }
 0x1c0   : > { %v2569_v30 = vpop.permute.xlu1 %892  ;;  %v2571_v55 = vpop.permute.xlu0 %955 }
 0x1c1   : > { %v1138_v37 = vmul.f32 %v1720_v47, %v2569_v30  ;;  %v1153_v12 = vmul.f32 %v1749_v33, %v2571_v55  ;;  %v1757_v47 = vunpack.c.h.bf16 %v1847_v32 }
 0x1c3   : > { %v1290_v59 = vadd.f32 %v1289_v31, %v1138_v37  ;;  %v1310_v15 = vadd.f32 %v1309_v61, %v1153_v12 }
 0x1c4   : > { %v2590_v20 = vpop.permute.xlu1 %959  ;;  %v2592_v58 = vpop.permute.xlu0 %1022 }
 0x1c5   : > { %v1169_v41 = vmul.f32 %v1781_v53, %v2592_v58  ;;  %v1154_v0 = vmul.f32 %v1752_v46, %v2590_v20  ;;  %v1760_v53 = vunpack.c.l.bf16 %v1848_v16 }
 0x1c7   : > { %v1331_v21 = vadd.f32 %v1330_v49, %v1169_v41  ;;  %v1311_v46 = vadd.f32 %v1310_v15, %v1154_v0  ;;  %v511_v15 = vld [vmem:[#allocation2] sm:$0xff] }
 0x1c8   : > { %v2618_v34 = vpop.permute.xlu1 %1026  ;;  %v2620_v36 = vpop.permute.xlu0 %896 }
 0x1c9   : > { %v1139_v22 = vmul.f32 %v1721_v54, %v2620_v36  ;;  %v1170_v55 = vmul.f32 %v1784_v50, %v2618_v34  ;;  %v1789_v36 = vunpack.c.h.bf16 %v1855_v42  ;;  %v1792_v54 = vunpack.c.l.bf16 %v1856_v18 }
 0x1cb   : > { %v1291_v25 = vadd.f32 %v1290_v59, %v1139_v22  ;;  %v1332_v40 = vadd.f32 %v1331_v21, %v1170_v55  ;;  %v1369_v21 = vld [vmem:[#allocation3] sm:$0xff] }
 0x1cc   : > { %v2639_v43 = vpop.permute.xlu1 %900  ;;  %v2641_v14 = vpop.permute.xlu0 %963 }
 0x1cd   : > { %v1140_v33 = vmul.f32 %v1724_v17, %v2639_v43  ;;  %v1155_v58 = vmul.f32 %v1753_v23, %v2641_v14 }
 0x1cf   : > { %v1292_v34 = vadd.f32 %v1291_v25, %v1140_v33  ;;  %v1312_v57 = vadd.f32 %v1311_v46, %v1155_v58  ;;  %v2768_v33 = vld [vmem:[#allocation22_spill] sm:$0xff]  ;;  %v2139_v46 = vmov (!%p1532_p7), 0  }
 0x1d0   : > { %v968_v4 = vpop.permute.xlu1 %967  ;;  %v1031_v45 = vpop.permute.xlu0 %1030  ;;  %1972 = vset.pattern.permute.xlu0 (!%p1532_p7), %v2139_v46 }
 0x1d1   : > { %v1171_v28 = vmul.f32 %v1785_v7, %v1031_v45  ;;  %v1156_v29 = vmul.f32 %v1756_v24, %v968_v4 }
 0x1d3   : > { %v1333_v32 = vadd.f32 %v1332_v40, %v1171_v28  ;;  %v1313_v6 = vadd.f32 %v1312_v57, %v1156_v29 }
 0x1d4   : > { %v1035_v48 = vpop.permute.xlu1 %1034  ;;  %v905_v9 = vpop.permute.xlu0 %904 }
 0x1d5   : > { %v1141_v20 = vmul.f32 %v1725_v39, %v905_v9  ;;  %v1172_v50 = vmul.f32 %v1788_v27, %v1035_v48 }
 0x1d7   : > { %v1293_v14 = vadd.f32 %v1292_v34, %v1141_v20  ;;  %v1334_v4 = vadd.f32 %v1333_v32, %v1172_v50 }
 0x1d8   : > { %v909_v11 = vpop.permute.xlu1 %908  ;;  %v972_v30 = vpop.permute.xlu0 %971 }
 0x1d9   : > { %v1142_v43 = vmul.f32 %v1728_v38, %v909_v11  ;;  %v1157_v60 = vmul.f32 %v1757_v47, %v972_v30 }
 0x1db   : > { %v1294_v8 = vadd.f32 %v1293_v14, %v1142_v43  ;;  %v1314_v26 = vadd.f32 %v1313_v6, %v1157_v60 }
 0x1dc   : > { %v976_v63 = vpop.permute.xlu1 %975  ;;  %v1039_v1 = vpop.permute.xlu0 %1038 }
 0x1dd   : > { %v1173_v13 = vmul.f32 %v1789_v36, %v1039_v1  ;;  %v1158_v17 = vmul.f32 %v1760_v53, %v976_v63 }
 0x1df   : > { %v1335_v5 = vadd.f32 %v1334_v4, %v1173_v13  ;;  %v1315_v7 = vadd.f32 %v1314_v26, %v1158_v17 }
 0x1e0   : > { %v1043_v23 = vpop.permute.xlu1 %1042  ;;  %v913_v45 = vpop.permute.xlu0 %912 }
 0x1e1   : > { %v1174_v35 = vmul.f32 %v1792_v54, %v1043_v23  ;;  %v1143_v42 = vmul.f32 %v1729_v52, %v913_v45 }
 0x1e3   : > { %v1295_v24 = vadd.f32 %v1294_v8, %v1143_v42  ;;  %v1336_v2 = vadd.f32 %v1335_v5, %v1174_v35 }
 0x1e4   : > { %v1047_v48 = vpop.permute.xlu1 %1046  ;;  %v980_v9 = vpop.permute.xlu0 %979 }
 0x1e5   : > { %v1296_v44 = vrot.slane %v1295_v24, 4  ;;  %v1175_v3 = vmul.f32 %v1793_v10, %v1047_v48  ;;  %v1159_v37 = vmul.f32 %v1761_v56, %v980_v9 }
 0x1e7   : > { %v1297_v62 = vadd.f32 %v1296_v44, %v1295_v24  ;;  %v1337_v19 = vadd.f32 %v1336_v2, %v1175_v3  ;;  %v1316_v12 = vadd.f32 %v1315_v7, %v1159_v37 }
 0x1e9   : > { %v1298_v27 = vrot.slane %v1297_v62, 2  ;;  %v1338_v39 = vrot.slane %v1337_v19, 4  ;;  %v1317_v51 = vrot.slane %v1316_v12, 4 }
 0x1eb   : > { %v1299_v31 = vadd.f32 %v1298_v27, %v1297_v62  ;;  %v1339_v41 = vadd.f32 %v1338_v39, %v1337_v19  ;;  %v1318_v22 = vadd.f32 %v1317_v51, %v1316_v12 }
 0x1ed   : > { %v1300_v16 = vrot.slane %v1299_v31, 1  ;;  %v1340_v61 = vrot.slane %v1339_v41, 2  ;;  %v1319_v0 = vrot.slane %v1318_v22, 2 }
 0x1ef   : > { %v1341_v11 = vadd.f32 %v1340_v61, %v1339_v41  ;;  %v1320_v38 = vadd.f32 %v1319_v0, %v1318_v22  ;;  %v1301_v30 = vadd.f32 %v1300_v16, %v1299_v31 }
 0x1f1   : > { %v1342_v47 = vrot.slane %v1341_v11, 1  ;;  %v1321_v49 = vrot.slane %v1320_v38, 1  ;;  %v1361_v18 = vsel %vm1360_vm5, %v1301_v30, %v2768_v33 }
 0x1f3   : > { %v1343_v59 = vadd.f32 %v1342_v47, %v1341_v11  ;;  %v1322_v55 = vadd.f32 %v1321_v49, %v1320_v38 }
 0x1f5   : > { %v1363_v58 = vsel %vm1362_vm6, %v1322_v55, %v1361_v18 }
 0x1f6   : > { %v1365_v53 = vsel %vm1364_vm7, %v1343_v59, %v1363_v58 }
 0x1f7   : > { %v1367_v36 = vadd.f32 %v1365_v53, %v511_v15 }
 0x1f9   : > { %1368 = vst [vmem:[#allocation2] sm:$0xff] %v1367_v36 }
 0x200   : > { %v1382_v1 = vld [vmem:[#allocation2] sm:$0xff] (!%p1532_p7) }
 0x21b   : > { %1378 = sbr.rel (%p1532_p7) target bundleno = 697 (0x2b9), region = 44 }
 0x21e   : > { %v1371_v25 = vpop.xlane.xlu0 %1370 }
 0x21f   : > { %v1372_v28 = vadd.f32 %v1371_v25, %v1369_v21 }
 0x221   : > { %1374 = vst.msk [vmem:[#allocation3] sm:$0xff] %vm1373_vm8, %v1372_v28 }
 0x228   : > { %v1379_v20 = vld [vmem:[#allocation3] sm:$0xff] }
 0x229   : > { %v1380_v29 = vmax.f32 %v1379_v20, 1.0 }
 0x22b   : > { %1973 = vrcp.f32 %v1380_v29 }
 0x235   : > { %v1974_v63 = vpop.eup %1973 }
 0x236   : > { %1385 = vperm.xlu0 %1972, %v1974_v63  }
 0x2b5   : > { %v1386_v54 = vpop.permute.xlu0 %1385 }
 0x2b6   : > { %v1388_v52 = vmul.f32 %v1386_v54, %v1382_v1 }
 0x2b8   : > { %1389 = vst [vmem:[%s244_s14] sm:$0xff] %v1388_v52 }
 0x2b9 PF: > { %s1534_s15 = sshll.u32 %s2117_s16, 7  ;;  %s1404_s4 = sshll.u32 %s244_s14, 4  ;;  %s1405_s4 = int_to_ptr.vmem [resolvable:$true] %s1404_s4 }
 0x2ba   : > { %s2687_s21 = scalar_lea.hbm %s2749_s2, %s1534_s15  ;;  %s1391_s30 = scalar_lea.sflag [#allocation6], %s242_s23 }
 0x2bb   : > { %s2003_s7 = scalar_lea.vmem %s1405_s4, 128  ;;  %p2769_p1 = scmp.ne.s32.totalorder %s2762_s3, 0 }
 0x2bc   : > { %p2004_p12 = scmp.ne.s32.totalorder %s1405_s4, %s2003_s7  ;;  %s2140_s22 = smov [#allocation9]  }
 0x2bd   : > { %s2007_s5 = sshll.u32 %s2140_s22, 4  ;;  %s2008_s5 = int_to_ptr.vmem [resolvable:$false] %s2007_s5 }
 0x2be   : > { %p2005_p13 = pnand %p2004_p12, %p2769_p1  ;;  %s2009_s12 = scalar_lea.vmem %s2008_s5, 256 }
 0x2bf   : > { %p2010_p2 = scmp.lt.s32.totalorder %s1405_s4, %s2008_s5  ;;  %p2011_p4 = scmp.lt.s32.totalorder %s2009_s12, %s2003_s7 }
 0x2c0   : > { %p2006_p0 = pneg %p2005_p13 }
 0x2c1   : > { %p2012_p5 = por %p2011_p4, %p2010_p2 }
 0x2c3   : > { %p2013_p8 = pnand %p2012_p5, %p2006_p0 }
 0x2c5   : > { %2016 = shalt.err (!%p2013_p8)
}
 0x2c6   : > { %s2017_s16 = scalar_lea.hbm %s2687_s21, 128  ;;  %s2021_s8 = scalar_lea.hbm %s2749_s2, 256 }
 0x2c7   : > { %p2018_p9 = scmp.ne.s32.totalorder %s2687_s21, %s2017_s16  ;;  %p2022_p11 = scmp.lt.u32.totalorder %s2687_s21, %s2749_s2 }
 0x2c8   : > { %p2023_p3 = scmp.lt.u32.totalorder %s2021_s8, %s2017_s16  ;;  %p2025_p12 = scmp.lt.u32.totalorder %s2017_s16, %s2687_s21 }
 0x2c9   : > { %p2019_p6 = pnand %p2018_p9, %p2769_p1 }
 0x2ca   : > { %p2024_p7 = por %p2023_p3, %p2022_p11 }
 0x2cb   : > { %p2020_p10 = pneg %p2019_p6 }
 0x2cc   : > { %p2026_p13 = por %p2025_p12, %p2024_p7 }
 0x2ce   : > { %p2027_p0 = pnand %p2026_p13, %p2020_p10 }
 0x2d0   : > { %2030 = shalt.err (!%p2027_p0)
}
 0x2d1   : > { %1868 = dma.vmem_to_hbm [thread:$0]  (%p2769_p1), %s1405_s4, 128, %s2687_s21, %s1391_s30  }
 0x2d2 PF: > { %p1874_p2 = scmp.ge.s32.totalorder %s2129_s19, 2  ;;  %s1416_s26 = sand.u32 1, %s2089_s9  }
 0x2d3   : > { %p2770_p4 = scmp.ne.s32.totalorder %s2765_s6, 0  ;;  %s1417_s20 = scalar_lea.sflag [#allocation6], %s1416_s26 }
 0x2d5   : > { %p1871_p5 = pnand %p1874_p2, %p2770_p4 }
 0x2d7   : > { %2084 = dma.done.wait (!%p1871_p5), %s1417_s20, 128  }
 0x2d8   : > { %2086 = vsyncadd (!%p1871_p5), %s1417_s20, 4294967168  ;;  %s21_s19 = sadd.s32 1, %s2129_s19   ;;  %s2771_s23 = sld [smem:[#allocation16_spill]] }
 0x2d9   : > { %p18_p8 = scmp.ge.s32.totalorder %s21_s19, 6   ;;  %s2772_s11 = sld [smem:[#allocation20_spill]] }
 0x2da   : > { %s2773_s3 = sld [smem:[#allocation17_spill]]  ;;  %s2774_s14 = sld [smem:[#allocation21_spill]] }
 0x2db   : > { %s2775_s29 = sld [smem:[#allocation18_spill]]  ;;  %s2776_s28 = sld [smem:[#allocation19_spill]] }
 0x2dc   : > { %s2777_s9 = smov %s2093_s10  ;;  %s2779_s12 = smov %s2105_s13 }
 0x2dd   : > { %s2781_s15 = smov %s2121_s17  ;;  %s2782_s16 = smov %s2125_s18 }
 0x2de   : > { %s2778_s10 = smov %s2771_s23  ;;  %20 = sbr.rel (!%p18_p8) target bundleno = 13 (0xd), region = 99 }
 0x2e0   : > { %s2780_s13 = smov %s2773_s3 }
 0x2e1   : > { %s2783_s17 = smov %s2775_s29  ;;  %s2784_s18 = smov %s2776_s28 }
 0x2e5   :  { %1422 = vsyncpa [#allocation5], 1 }
 0x2e6   :  { %1424 = vsyncpa [#allocation5 + $0x1], 1 }
 0x2e7   :  { %1425 = vsyncpa [#allocation8], 1 }
 0x2e8   :  { %1427 = vsyncpa [#allocation8 + $0x1], 1 }
 0x2e9   :  { %1428 = vsyncpa [#allocation6], 1 }
 0x2ea   :  { %1430 = vsyncpa [#allocation6 + $0x1], 1 }

</bundles_post_ra>
